<compile_context>
chip_gen: v7x
topology: tpu7x:2x2x1
jax: 0.10.0
libtpu: 0.0.40
codegen_flags: <defaults>
</compile_context>

<pallas_src>
import math
import jax
import jax.numpy as jnp
from jax.experimental import pallas as pl
from jax.experimental.pallas import tpu as pltpu

# ---------------- synthetic "bert.config" ----------------
B, S = 2, 8              # batch, seq len
H = 32                   # hidden size
NUM_HEADS = 4
DH = H // NUM_HEADS
FF = 64                  # intermediate size
NUM_LAYERS = 2
VOCAB = 30
MAX_POS = 16
TYPE_VOCAB = 2
NUM_CLASS = 3            # W_hy exists in __init__ but is unused in forward()
EPS = 1e-12              # BERT LayerNorm eps
SCALE = 1.0 / math.sqrt(DH)
BS = B * S               # flattened batch*seq rows fed to the MXU

# packed-vector operand layout (one row per bias / LN vector, lane-padded to 128)
VEC_WIDTH = 128
ROW_EMB_G, ROW_EMB_B = 0, 1
R_BQKV, R_BO, R_B1, R_B2, R_LN1G, R_LN1B, R_LN2G, R_LN2B = range(8)
ROWS_PER_LAYER = 8
N_VEC_ROWS = 2 + NUM_LAYERS * ROWS_PER_LAYER


def _ln(x, g, b):
    mu = jnp.mean(x, axis=-1, keepdims=True)
    var = jnp.mean(jnp.square(x - mu), axis=-1, keepdims=True)
    return (x - mu) * jax.lax.rsqrt(var + EPS) * g + b


def _gelu(x):
    # TODO(synk): HF BERT uses exact (erf) GELU; tanh approximation used here for TPU EUP.
    return jax.nn.gelu(x, approximate=True)


# ---------------- fused Pallas kernel: whole encoder forward, whole batch ----------------
def fused_bert_kernel(emb_ref, mask_ref, vec_ref,
                      wqkv_ref, wo_ref, w1_ref, w2_ref, o_ref, ctx_sc):
    x = emb_ref[...]                                  # (B*S, H) f32
    m = mask_ref[...].astype(jnp.float32)             # (B, S) int -> float
    mask_add = (1.0 - m) * -10000.0                   # additive attention mask, (B, S)

    def vrow(r, w):
        return vec_ref[r:r + 1, :w]                   # (1, w) static slice, f32

    # embedding LayerNorm
    h = _ln(x, vrow(ROW_EMB_G, H), vrow(ROW_EMB_B, H))

    for l in range(NUM_LAYERS):                       # static unroll over layers
        base = 2 + l * ROWS_PER_LAYER
        bqkv = vrow(base + R_BQKV, 3 * H)
        bo = vrow(base + R_BO, H)
        b1 = vrow(base + R_B1, FF)
        b2 = vrow(base + R_B2, H)
        ln1g, ln1b = vrow(base + R_LN1G, H), vrow(base + R_LN1B, H)
        ln2g, ln2b = vrow(base + R_LN2G, H), vrow(base + R_LN2B, H)

        # ---- fused QKV projection: one bf16 MXU push over the whole (B*S, H) batch ----
        qkv = jnp.dot(h.astype(jnp.bfloat16), wqkv_ref[l],
                      preferred_element_type=jnp.float32) + bqkv    # (B*S, 3H) f32

        # ---- attention: static loop over (batch, head); write ctx into scratch ----
        for b in range(B):
            madd = mask_add[b:b + 1, :]               # (1, S), broadcasts over query rows
            r0 = b * S
            for hd in range(NUM_HEADS):
                qh = qkv[r0:r0 + S, hd * DH:(hd + 1) * DH]                  # (S, DH)
                kh = qkv[r0:r0 + S, H + hd * DH:H + (hd + 1) * DH]          # (S, DH)
                vh = qkv[r0:r0 + S, 2 * H + hd * DH:2 * H + (hd + 1) * DH]  # (S, DH)
                # transpose-free scores: contract DH of both operands (no kh.T)
                s = jnp.einsum('qd,kd->qk', qh, kh,
                               preferred_element_type=jnp.float32) * SCALE
                s = s + madd
                # max-subtraction dropped (exact math; masked logits underflow to 0;
                # relies on every query row having >=1 unmasked key and O(1) scores)
                p = jnp.exp(s)
                p = p * pl.reciprocal(jnp.sum(p, axis=-1, keepdims=True), approx=True)
                ctx = jnp.dot(p, vh, preferred_element_type=jnp.float32)    # (S, DH)
                ctx_sc[r0:r0 + S, hd * DH:(hd + 1) * DH] = ctx

        # ---- ONE output projection for all batches/heads (bf16 MXU) ----
        attn = jnp.dot(ctx_sc[...].astype(jnp.bfloat16), wo_ref[l],
                       preferred_element_type=jnp.float32) + bo
        h = _ln(h + attn, ln1g, ln1b)

        # ---- FFN (bf16 MXU, f32 accumulation) ----
        h1 = jnp.dot(h.astype(jnp.bfloat16), w1_ref[l],
                     preferred_element_type=jnp.float32) + b1
        h1 = _gelu(h1)
        h2 = jnp.dot(h1.astype(jnp.bfloat16), w2_ref[l],
                     preferred_element_type=jnp.float32) + b2
        h = _ln(h + h2, ln2g, ln2b)

    o_ref[...] = h


# ---------------- one-time parameter packing (hoisted out of the forward path) ----------------
def _pad_row(v):
    v = jnp.asarray(v, jnp.float32).reshape(-1)
    return jnp.pad(v, (0, VEC_WIDTH - v.shape[0]))


def pack_params(params):
    rows = [params["emb_ln_g"], params["emb_ln_b"]]
    wqkv, wo, w1, w2 = [], [], [], []
    for lp in params["layers"]:
        rows += [
            jnp.concatenate([lp["bq"].reshape(-1), lp["bk"].reshape(-1),
                             lp["bv"].reshape(-1)]),
            lp["bo"], lp["b1"], lp["b2"],
            lp["ln1_g"], lp["ln1_b"], lp["ln2_g"], lp["ln2_b"],
        ]
        wqkv.append(jnp.concatenate([lp["wq"], lp["wk"], lp["wv"]], axis=1))
        wo.append(lp["wo"])
        w1.append(lp["w1"])
        w2.append(lp["w2"])
    vecs = jnp.stack([_pad_row(r) for r in rows])                 # (N_VEC_ROWS, 128) f32
    pad_rows = (-vecs.shape[0]) % 8                               # sublane-align
    if pad_rows:
        vecs = jnp.pad(vecs, ((0, pad_rows), (0, 0)))
    to_bf16 = lambda ws: jnp.stack(ws).astype(jnp.bfloat16)       # bf16 weights for MXU
    return vecs, to_bf16(wqkv), to_bf16(wo), to_bf16(w1), to_bf16(w2)


# ---------------- pallas_call wrapper: single grid step, whole batch ----------------
def bert_encoder(emb2d, attention_mask, packed):
    vecs, wqkv, wo, w1, w2 = packed
    mask = attention_mask.astype(jnp.int32)                       # (B, S)

    def _full(shape):
        nd = len(shape)
        return pl.BlockSpec(shape, lambda i, _nd=nd: (0,) * _nd)

    out = pl.pallas_call(
        fused_bert_kernel,
        out_shape=jax.ShapeDtypeStruct((BS, H), jnp.float32),
        grid_spec=pltpu.PrefetchScalarGridSpec(
            num_scalar_prefetch=0,
            grid=(1,),                                            # one step: whole batch
            in_specs=[
                _full((BS, H)),                                   # embeddings (B*S, H) f32
                _full((B, S)),                                    # int attention mask
                _full(vecs.shape),                                # packed biases / LN vectors
                _full(wqkv.shape),                                # (L, H, 3H) bf16
                _full(wo.shape),                                  # (L, H, H) bf16
                _full(w1.shape),                                  # (L, H, FF) bf16
                _full(w2.shape),                                  # (L, FF, H) bf16
            ],
            out_specs=_full((BS, H)),
            scratch_shapes=[pltpu.VMEM((BS, H), jnp.float32)]),   # per-layer ctx scratch
        compiler_params=pltpu.CompilerParams(
            dimension_semantics=("arbitrary",)),                  # no 2-TC split at this size
    )(emb2d, mask, vecs, wqkv, wo, w1, w2)
    return out.reshape(B, S, H)


# ---------------- parameters (deterministic synthetic init) ----------------
def init_params(key):
    ks = iter(jax.random.split(key, 64))
    std = 0.02

    def nrm(shape):
        return (std * jax.random.normal(next(ks), shape)).astype(jnp.float32)

    params = {
        "word_emb": nrm((VOCAB, H)),
        "pos_emb": nrm((MAX_POS, H)),
        "type_emb": nrm((TYPE_VOCAB, H)),
        "emb_ln_g": jnp.ones((1, H), jnp.float32),
        "emb_ln_b": jnp.zeros((1, H), jnp.float32),
        # W_hy exists in the PyTorch module's __init__ (unused by forward())
        "W_hy": nrm((H, NUM_CLASS)),
        "b_hy": jnp.zeros((1, NUM_CLASS), jnp.float32),
        "layers": [],
    }
    for _ in range(NUM_LAYERS):
        params["layers"].append({
            "wq": nrm((H, H)), "bq": jnp.zeros((1, H), jnp.float32),
            "wk": nrm((H, H)), "bk": jnp.zeros((1, H), jnp.float32),
            "wv": nrm((H, H)), "bv": jnp.zeros((1, H), jnp.float32),
            "wo": nrm((H, H)), "bo": jnp.zeros((1, H), jnp.float32),
            "ln1_g": jnp.ones((1, H), jnp.float32),
            "ln1_b": jnp.zeros((1, H), jnp.float32),
            "w1": nrm((H, FF)), "b1": jnp.zeros((1, FF), jnp.float32),
            "w2": nrm((FF, H)), "b2": jnp.zeros((1, H), jnp.float32),
            "ln2_g": jnp.ones((1, H), jnp.float32),
            "ln2_b": jnp.zeros((1, H), jnp.float32),
        })
    return params


# ---------------- forward: emoClassifer.forward(X) -> H_all ----------------
def emo_classifier_forward(X, word_emb, pos_emb, type_emb, packed):
    input_ids = X[:, 0]        # (B, S)
    token_type_ids = X[:, 1]   # (B, S)
    attention_mask = X[:, 2]   # (B, S)

    # Embedding gathers are glue, done in plain JAX.
    pos_ids = jnp.arange(S, dtype=jnp.int32)
    emb = (word_emb[input_ids]
           + pos_emb[pos_ids][None, :, :]
           + type_emb[token_type_ids])                            # (B, S, H)

    return bert_encoder(emb.reshape(BS, H), attention_mask, packed)   # H_all: (B, S, H)


if __name__ == "__main__":
    key = jax.random.PRNGKey(0)
    k_params, k_ids, k_mask = jax.random.split(key, 3)
    params = init_params(k_params)
    packed = pack_params(params)   # one-time packing, hoisted out of the per-call path

    input_ids = jax.random.randint(k_ids, (B, S), 0, VOCAB, dtype=jnp.int32)
    token_type_ids = jnp.zeros((B, S), jnp.int32)
    lens = jnp.array([S, S - 3], jnp.int32)            # first few tokens attended
    attention_mask = (jnp.arange(S)[None, :] < lens[:, None]).astype(jnp.int32)
    X = jnp.stack([input_ids, token_type_ids, attention_mask], axis=1)  # (B, 3, S)

    fwd = jax.jit(lambda Xin: emo_classifier_forward(
        Xin, params["word_emb"], params["pos_emb"], params["type_emb"], packed))

    H_all = fwd(X)
    H_all = jax.block_until_ready(H_all)
    assert H_all.shape == (B, S, H) and H_all.dtype == jnp.float32
    assert bool(jnp.all(jnp.isfinite(H_all)))
    print("KERNEL_OK")
</pallas_src>

<mosaic_0001>
module attributes {stable_mosaic.version = 11 : i64} {
  func.func @fused_bert_kernel(%arg0: i32, %arg1: memref<16x32xf32, #tpu.memory_space<vmem>>, %arg2: memref<2x8xi32, #tpu.memory_space<vmem>>, %arg3: memref<24x128xf32, #tpu.memory_space<vmem>>, %arg4: memref<2x32x96xbf16, #tpu.memory_space<vmem>>, %arg5: memref<2x32x32xbf16, #tpu.memory_space<vmem>>, %arg6: memref<2x32x64xbf16, #tpu.memory_space<vmem>>, %arg7: memref<2x64x32xbf16, #tpu.memory_space<vmem>>, %arg8: memref<16x32xf32, #tpu.memory_space<vmem>>, %arg9: memref<16x32xf32, #tpu.memory_space<vmem>>) attributes {dimension_semantics = [#tpu.dimension_semantics<arbitrary>], iteration_bounds = array<i64: 1>, scalar_prefetch = 0 : i64, scratch_operands = 1 : i64, tpu.core_type = #tpu.core_type<tc>, window_params = [{pipeline_mode = #tpu.pipeline_mode<synchronous>, transform_indices = @transform_0, window_bounds = array<i64: 16, 32>}, {pipeline_mode = #tpu.pipeline_mode<synchronous>, transform_indices = @transform_1, window_bounds = array<i64: 2, 8>}, {pipeline_mode = #tpu.pipeline_mode<synchronous>, transform_indices = @transform_2, window_bounds = array<i64: 24, 128>}, {pipeline_mode = #tpu.pipeline_mode<synchronous>, transform_indices = @transform_3, window_bounds = array<i64: 2, 32, 96>}, {pipeline_mode = #tpu.pipeline_mode<synchronous>, transform_indices = @transform_4, window_bounds = array<i64: 2, 32, 32>}, {pipeline_mode = #tpu.pipeline_mode<synchronous>, transform_indices = @transform_5, window_bounds = array<i64: 2, 32, 64>}, {pipeline_mode = #tpu.pipeline_mode<synchronous>, transform_indices = @transform_6, window_bounds = array<i64: 2, 64, 32>}, {pipeline_mode = #tpu.pipeline_mode<synchronous>, transform_indices = @transform_7, window_bounds = array<i64: 16, 32>}]} {
    %c0 = arith.constant 0 : index
    %c0_0 = arith.constant 0 : index
    %0 = vector.load %arg1[%c0, %c0_0] : memref<16x32xf32, #tpu.memory_space<vmem>>, vector<16x32xf32>
    %c0_1 = arith.constant 0 : index
    %c0_2 = arith.constant 0 : index
    %1 = vector.load %arg2[%c0_1, %c0_2] : memref<2x8xi32, #tpu.memory_space<vmem>>, vector<2x8xi32>
    %2 = arith.sitofp %1 : vector<2x8xi32> to vector<2x8xf32>
    %cst = arith.constant 1.000000e+00 : f32
    %3 = vector.broadcast %cst : f32 to vector<2x8xf32>
    %4 = arith.subf %3, %2 : vector<2x8xf32>
    %cst_3 = arith.constant -1.000000e+04 : f32
    %5 = vector.broadcast %cst_3 : f32 to vector<2x8xf32>
    %6 = arith.mulf %4, %5 : vector<2x8xf32>
    %c0_4 = arith.constant 0 : index
    %c0_5 = arith.constant 0 : index
    %7 = vector.load %arg3[%c0_4, %c0_5] : memref<24x128xf32, #tpu.memory_space<vmem>>, vector<1x32xf32>
    %c1 = arith.constant 1 : index
    %c0_6 = arith.constant 0 : index
    %8 = vector.load %arg3[%c1, %c0_6] : memref<24x128xf32, #tpu.memory_space<vmem>>, vector<1x32xf32>
    %cst_7 = arith.constant dense<0.000000e+00> : vector<16xf32>
    %9 = vector.multi_reduction <add>, %0, %cst_7 [1] : vector<16x32xf32> to vector<16xf32>
    %10 = vector.shape_cast %9 : vector<16xf32> to vector<16x1xf32>
    %cst_8 = arith.constant 3.200000e+01 : f32
    %11 = vector.broadcast %cst_8 : f32 to vector<16x1xf32>
    %12 = arith.divf %10, %11 : vector<16x1xf32>
    %13 = vector.broadcast %12 : vector<16x1xf32> to vector<16x32xf32>
    %14 = arith.subf %0, %13 : vector<16x32xf32>
    %15 = arith.mulf %14, %14 : vector<16x32xf32>
    %cst_9 = arith.constant dense<0.000000e+00> : vector<16xf32>
    %16 = vector.multi_reduction <add>, %15, %cst_9 [1] : vector<16x32xf32> to vector<16xf32>
    %17 = vector.shape_cast %16 : vector<16xf32> to vector<16x1xf32>
    %cst_10 = arith.constant 3.200000e+01 : f32
    %18 = vector.broadcast %cst_10 : f32 to vector<16x1xf32>
    %19 = arith.divf %17, %18 : vector<16x1xf32>
    %20 = vector.broadcast %12 : vector<16x1xf32> to vector<16x32xf32>
    %21 = arith.subf %0, %20 : vector<16x32xf32>
    %cst_11 = arith.constant 9.99999996E-13 : f32
    %22 = vector.broadcast %cst_11 : f32 to vector<16x1xf32>
    %23 = arith.addf %19, %22 : vector<16x1xf32>
    %24 = math.rsqrt %23 : vector<16x1xf32>
    %25 = vector.broadcast %24 : vector<16x1xf32> to vector<16x32xf32>
    %26 = arith.mulf %21, %25 : vector<16x32xf32>
    %27 = vector.broadcast %7 : vector<1x32xf32> to vector<16x32xf32>
    %28 = arith.mulf %26, %27 : vector<16x32xf32>
    %29 = vector.broadcast %8 : vector<1x32xf32> to vector<16x32xf32>
    %30 = arith.addf %28, %29 : vector<16x32xf32>
    %c2 = arith.constant 2 : index
    %c0_12 = arith.constant 0 : index
    %31 = vector.load %arg3[%c2, %c0_12] : memref<24x128xf32, #tpu.memory_space<vmem>>, vector<1x96xf32>
    %c3 = arith.constant 3 : index
    %c0_13 = arith.constant 0 : index
    %32 = vector.load %arg3[%c3, %c0_13] : memref<24x128xf32, #tpu.memory_space<vmem>>, vector<1x32xf32>
    %c4 = arith.constant 4 : index
    %c0_14 = arith.constant 0 : index
    %33 = vector.load %arg3[%c4, %c0_14] : memref<24x128xf32, #tpu.memory_space<vmem>>, vector<1x64xf32>
    %c5 = arith.constant 5 : index
    %c0_15 = arith.constant 0 : index
    %34 = vector.load %arg3[%c5, %c0_15] : memref<24x128xf32, #tpu.memory_space<vmem>>, vector<1x32xf32>
    %c6 = arith.constant 6 : index
    %c0_16 = arith.constant 0 : index
    %35 = vector.load %arg3[%c6, %c0_16] : memref<24x128xf32, #tpu.memory_space<vmem>>, vector<1x32xf32>
    %c7 = arith.constant 7 : index
    %c0_17 = arith.constant 0 : index
    %36 = vector.load %arg3[%c7, %c0_17] : memref<24x128xf32, #tpu.memory_space<vmem>>, vector<1x32xf32>
    %c8 = arith.constant 8 : index
    %c0_18 = arith.constant 0 : index
    %37 = vector.load %arg3[%c8, %c0_18] : memref<24x128xf32, #tpu.memory_space<vmem>>, vector<1x32xf32>
    %c9 = arith.constant 9 : index
    %c0_19 = arith.constant 0 : index
    %38 = vector.load %arg3[%c9, %c0_19] : memref<24x128xf32, #tpu.memory_space<vmem>>, vector<1x32xf32>
    %39 = arith.truncf %30 : vector<16x32xf32> to vector<16x32xbf16>
    %c0_20 = arith.constant 0 : index
    %c0_21 = arith.constant 0 : index
    %c0_22 = arith.constant 0 : index
    %40 = vector.load %arg4[%c0_20, %c0_21, %c0_22] : memref<2x32x96xbf16, #tpu.memory_space<vmem>>, vector<1x32x96xbf16>
    %41 = vector.shape_cast %40 : vector<1x32x96xbf16> to vector<32x96xbf16>
    %cst_23 = arith.constant dense<0.000000e+00> : vector<16x96xf32>
    %42 = tpu.matmul %39, %41, %cst_23 {dimension_numbers = #tpu.dot_dimension_numbers<[1], [0], [0], [1], [0, 0, 1, 1], [], []>} : vector<16x32xbf16>, vector<32x96xbf16>, vector<16x96xf32> -> vector<16x96xf32>
    %43 = vector.broadcast %31 : vector<1x96xf32> to vector<16x96xf32>
    %44 = arith.addf %42, %43 : vector<16x96xf32>
    %45 = vector.extract_strided_slice %6 {offsets = [0, 0], sizes = [1, 8], strides = [1, 1]} : vector<2x8xf32> to vector<1x8xf32>
    %46 = vector.extract_strided_slice %44 {offsets = [0, 0], sizes = [8, 8], strides = [1, 1]} : vector<16x96xf32> to vector<8x8xf32>
    %47 = vector.extract_strided_slice %44 {offsets = [0, 32], sizes = [8, 8], strides = [1, 1]} : vector<16x96xf32> to vector<8x8xf32>
    %48 = vector.extract_strided_slice %44 {offsets = [0, 64], sizes = [8, 8], strides = [1, 1]} : vector<16x96xf32> to vector<8x8xf32>
    "tpu.trace_start"() <{level = 10 : i32, message = "qd,kd->qk"}> : () -> ()
    %cst_24 = arith.constant dense<0.000000e+00> : vector<8x8xf32>
    %49 = tpu.matmul %46, %47, %cst_24 {dimension_numbers = #tpu.dot_dimension_numbers<[1], [1], [0], [0], [0, 0, 1, 0], [], []>} : vector<8x8xf32>, vector<8x8xf32>, vector<8x8xf32> -> vector<8x8xf32>
    "tpu.trace_stop"() : () -> ()
    %cst_25 = arith.constant 0.353553385 : f32
    %50 = vector.broadcast %cst_25 : f32 to vector<8x8xf32>
    %51 = arith.mulf %49, %50 : vector<8x8xf32>
    %52 = vector.broadcast %45 : vector<1x8xf32> to vector<8x8xf32>
    %53 = arith.addf %51, %52 : vector<8x8xf32>
    %54 = math.exp %53 : vector<8x8xf32>
    %cst_26 = arith.constant dense<0.000000e+00> : vector<8xf32>
    %55 = vector.multi_reduction <add>, %54, %cst_26 [1] : vector<8x8xf32> to vector<8xf32>
    %56 = vector.shape_cast %55 : vector<8xf32> to vector<8x1xf32>
    %57 = tpu.reciprocal %56 {approx = true} : vector<8x1xf32> -> vector<8x1xf32>
    %58 = vector.broadcast %57 : vector<8x1xf32> to vector<8x8xf32>
    %59 = arith.mulf %54, %58 : vector<8x8xf32>
    %cst_27 = arith.constant dense<0.000000e+00> : vector<8x8xf32>
    %60 = tpu.matmul %59, %48, %cst_27 {dimension_numbers = #tpu.dot_dimension_numbers<[1], [0], [0], [1], [0, 0, 1, 1], [], []>} : vector<8x8xf32>, vector<8x8xf32>, vector<8x8xf32> -> vector<8x8xf32>
    %c0_28 = arith.constant 0 : index
    %c0_29 = arith.constant 0 : index
    %61 = vector.load %arg9[%c0_28, %c0_29] : memref<16x32xf32, #tpu.memory_space<vmem>>, vector<8x8xf32>
    tpu.vector_store %arg9[%c0_28, %c0_29], %60 {strides = array<i32>} : memref<16x32xf32, #tpu.memory_space<vmem>>, vector<8x8xf32>,
    %62 = vector.extract_strided_slice %44 {offsets = [0, 8], sizes = [8, 8], strides = [1, 1]} : vector<16x96xf32> to vector<8x8xf32>
    %63 = vector.extract_strided_slice %44 {offsets = [0, 40], sizes = [8, 8], strides = [1, 1]} : vector<16x96xf32> to vector<8x8xf32>
    %64 = vector.extract_strided_slice %44 {offsets = [0, 72], sizes = [8, 8], strides = [1, 1]} : vector<16x96xf32> to vector<8x8xf32>
    "tpu.trace_start"() <{level = 10 : i32, message = "qd,kd->qk"}> : () -> ()
    %cst_30 = arith.constant dense<0.000000e+00> : vector<8x8xf32>
    %65 = tpu.matmul %62, %63, %cst_30 {dimension_numbers = #tpu.dot_dimension_numbers<[1], [1], [0], [0], [0, 0, 1, 0], [], []>} : vector<8x8xf32>, vector<8x8xf32>, vector<8x8xf32> -> vector<8x8xf32>
    "tpu.trace_stop"() : () -> ()
    %cst_31 = arith.constant 0.353553385 : f32
    %66 = vector.broadcast %cst_31 : f32 to vector<8x8xf32>
    %67 = arith.mulf %65, %66 : vector<8x8xf32>
    %68 = vector.broadcast %45 : vector<1x8xf32> to vector<8x8xf32>
    %69 = arith.addf %67, %68 : vector<8x8xf32>
    %70 = math.exp %69 : vector<8x8xf32>
    %cst_32 = arith.constant dense<0.000000e+00> : vector<8xf32>
    %71 = vector.multi_reduction <add>, %70, %cst_32 [1] : vector<8x8xf32> to vector<8xf32>
    %72 = vector.shape_cast %71 : vector<8xf32> to vector<8x1xf32>
    %73 = tpu.reciprocal %72 {approx = true} : vector<8x1xf32> -> vector<8x1xf32>
    %74 = vector.broadcast %73 : vector<8x1xf32> to vector<8x8xf32>
    %75 = arith.mulf %70, %74 : vector<8x8xf32>
    %cst_33 = arith.constant dense<0.000000e+00> : vector<8x8xf32>
    %76 = tpu.matmul %75, %64, %cst_33 {dimension_numbers = #tpu.dot_dimension_numbers<[1], [0], [0], [1], [0, 0, 1, 1], [], []>} : vector<8x8xf32>, vector<8x8xf32>, vector<8x8xf32> -> vector<8x8xf32>
    %c0_34 = arith.constant 0 : index
    %c8_35 = arith.constant 8 : index
    %77 = vector.load %arg9[%c0_34, %c8_35] : memref<16x32xf32, #tpu.memory_space<vmem>>, vector<8x8xf32>
    tpu.vector_store %arg9[%c0_34, %c8_35], %76 {strides = array<i32>} : memref<16x32xf32, #tpu.memory_space<vmem>>, vector<8x8xf32>,
    %78 = vector.extract_strided_slice %44 {offsets = [0, 16], sizes = [8, 8], strides = [1, 1]} : vector<16x96xf32> to vector<8x8xf32>
    %79 = vector.extract_strided_slice %44 {offsets = [0, 48], sizes = [8, 8], strides = [1, 1]} : vector<16x96xf32> to vector<8x8xf32>
    %80 = vector.extract_strided_slice %44 {offsets = [0, 80], sizes = [8, 8], strides = [1, 1]} : vector<16x96xf32> to vector<8x8xf32>
    "tpu.trace_start"() <{level = 10 : i32, message = "qd,kd->qk"}> : () -> ()
    %cst_36 = arith.constant dense<0.000000e+00> : vector<8x8xf32>
    %81 = tpu.matmul %78, %79, %cst_36 {dimension_numbers = #tpu.dot_dimension_numbers<[1], [1], [0], [0], [0, 0, 1, 0], [], []>} : vector<8x8xf32>, vector<8x8xf32>, vector<8x8xf32> -> vector<8x8xf32>
    "tpu.trace_stop"() : () -> ()
    %cst_37 = arith.constant 0.353553385 : f32
    %82 = vector.broadcast %cst_37 : f32 to vector<8x8xf32>
    %83 = arith.mulf %81, %82 : vector<8x8xf32>
    %84 = vector.broadcast %45 : vector<1x8xf32> to vector<8x8xf32>
    %85 = arith.addf %83, %84 : vector<8x8xf32>
    %86 = math.exp %85 : vector<8x8xf32>
    %cst_38 = arith.constant dense<0.000000e+00> : vector<8xf32>
    %87 = vector.multi_reduction <add>, %86, %cst_38 [1] : vector<8x8xf32> to vector<8xf32>
    %88 = vector.shape_cast %87 : vector<8xf32> to vector<8x1xf32>
    %89 = tpu.reciprocal %88 {approx = true} : vector<8x1xf32> -> vector<8x1xf32>
    %90 = vector.broadcast %89 : vector<8x1xf32> to vector<8x8xf32>
    %91 = arith.mulf %86, %90 : vector<8x8xf32>
    %cst_39 = arith.constant dense<0.000000e+00> : vector<8x8xf32>
    %92 = tpu.matmul %91, %80, %cst_39 {dimension_numbers = #tpu.dot_dimension_numbers<[1], [0], [0], [1], [0, 0, 1, 1], [], []>} : vector<8x8xf32>, vector<8x8xf32>, vector<8x8xf32> -> vector<8x8xf32>
    %c0_40 = arith.constant 0 : index
    %c16 = arith.constant 16 : index
    %93 = vector.load %arg9[%c0_40, %c16] : memref<16x32xf32, #tpu.memory_space<vmem>>, vector<8x8xf32>
    tpu.vector_store %arg9[%c0_40, %c16], %92 {strides = array<i32>} : memref<16x32xf32, #tpu.memory_space<vmem>>, vector<8x8xf32>,
    %94 = vector.extract_strided_slice %44 {offsets = [0, 24], sizes = [8, 8], strides = [1, 1]} : vector<16x96xf32> to vector<8x8xf32>
    %95 = vector.extract_strided_slice %44 {offsets = [0, 56], sizes = [8, 8], strides = [1, 1]} : vector<16x96xf32> to vector<8x8xf32>
    %96 = vector.extract_strided_slice %44 {offsets = [0, 88], sizes = [8, 8], strides = [1, 1]} : vector<16x96xf32> to vector<8x8xf32>
    "tpu.trace_start"() <{level = 10 : i32, message = "qd,kd->qk"}> : () -> ()
    %cst_41 = arith.constant dense<0.000000e+00> : vector<8x8xf32>
    %97 = tpu.matmul %94, %95, %cst_41 {dimension_numbers = #tpu.dot_dimension_numbers<[1], [1], [0], [0], [0, 0, 1, 0], [], []>} : vector<8x8xf32>, vector<8x8xf32>, vector<8x8xf32> -> vector<8x8xf32>
    "tpu.trace_stop"() : () -> ()
    %cst_42 = arith.constant 0.353553385 : f32
    %98 = vector.broadcast %cst_42 : f32 to vector<8x8xf32>
    %99 = arith.mulf %97, %98 : vector<8x8xf32>
    %100 = vector.broadcast %45 : vector<1x8xf32> to vector<8x8xf32>
    %101 = arith.addf %99, %100 : vector<8x8xf32>
    %102 = math.exp %101 : vector<8x8xf32>
    %cst_43 = arith.constant dense<0.000000e+00> : vector<8xf32>
    %103 = vector.multi_reduction <add>, %102, %cst_43 [1] : vector<8x8xf32> to vector<8xf32>
    %104 = vector.shape_cast %103 : vector<8xf32> to vector<8x1xf32>
    %105 = tpu.reciprocal %104 {approx = true} : vector<8x1xf32> -> vector<8x1xf32>
    %106 = vector.broadcast %105 : vector<8x1xf32> to vector<8x8xf32>
    %107 = arith.mulf %102, %106 : vector<8x8xf32>
    %cst_44 = arith.constant dense<0.000000e+00> : vector<8x8xf32>
    %108 = tpu.matmul %107, %96, %cst_44 {dimension_numbers = #tpu.dot_dimension_numbers<[1], [0], [0], [1], [0, 0, 1, 1], [], []>} : vector<8x8xf32>, vector<8x8xf32>, vector<8x8xf32> -> vector<8x8xf32>
    %c0_45 = arith.constant 0 : index
    %c24 = arith.constant 24 : index
    %109 = vector.load %arg9[%c0_45, %c24] : memref<16x32xf32, #tpu.memory_space<vmem>>, vector<8x8xf32>
    tpu.vector_store %arg9[%c0_45, %c24], %108 {strides = array<i32>} : memref<16x32xf32, #tpu.memory_space<vmem>>, vector<8x8xf32>,
    %110 = vector.extract_strided_slice %6 {offsets = [1, 0], sizes = [1, 8], strides = [1, 1]} : vector<2x8xf32> to vector<1x8xf32>
    %111 = vector.extract_strided_slice %44 {offsets = [8, 0], sizes = [8, 8], strides = [1, 1]} : vector<16x96xf32> to vector<8x8xf32>
    %112 = vector.extract_strided_slice %44 {offsets = [8, 32], sizes = [8, 8], strides = [1, 1]} : vector<16x96xf32> to vector<8x8xf32>
    %113 = vector.extract_strided_slice %44 {offsets = [8, 64], sizes = [8, 8], strides = [1, 1]} : vector<16x96xf32> to vector<8x8xf32>
    "tpu.trace_start"() <{level = 10 : i32, message = "qd,kd->qk"}> : () -> ()
    %cst_46 = arith.constant dense<0.000000e+00> : vector<8x8xf32>
    %114 = tpu.matmul %111, %112, %cst_46 {dimension_numbers = #tpu.dot_dimension_numbers<[1], [1], [0], [0], [0, 0, 1, 0], [], []>} : vector<8x8xf32>, vector<8x8xf32>, vector<8x8xf32> -> vector<8x8xf32>
    "tpu.trace_stop"() : () -> ()
    %cst_47 = arith.constant 0.353553385 : f32
    %115 = vector.broadcast %cst_47 : f32 to vector<8x8xf32>
    %116 = arith.mulf %114, %115 : vector<8x8xf32>
    %117 = vector.broadcast %110 : vector<1x8xf32> to vector<8x8xf32>
    %118 = arith.addf %116, %117 : vector<8x8xf32>
    %119 = math.exp %118 : vector<8x8xf32>
    %cst_48 = arith.constant dense<0.000000e+00> : vector<8xf32>
    %120 = vector.multi_reduction <add>, %119, %cst_48 [1] : vector<8x8xf32> to vector<8xf32>
    %121 = vector.shape_cast %120 : vector<8xf32> to vector<8x1xf32>
    %122 = tpu.reciprocal %121 {approx = true} : vector<8x1xf32> -> vector<8x1xf32>
    %123 = vector.broadcast %122 : vector<8x1xf32> to vector<8x8xf32>
    %124 = arith.mulf %119, %123 : vector<8x8xf32>
    %cst_49 = arith.constant dense<0.000000e+00> : vector<8x8xf32>
    %125 = tpu.matmul %124, %113, %cst_49 {dimension_numbers = #tpu.dot_dimension_numbers<[1], [0], [0], [1], [0, 0, 1, 1], [], []>} : vector<8x8xf32>, vector<8x8xf32>, vector<8x8xf32> -> vector<8x8xf32>
    %c8_50 = arith.constant 8 : index
    %c0_51 = arith.constant 0 : index
    %126 = vector.load %arg9[%c8_50, %c0_51] : memref<16x32xf32, #tpu.memory_space<vmem>>, vector<8x8xf32>
    tpu.vector_store %arg9[%c8_50, %c0_51], %125 {strides = array<i32>} : memref<16x32xf32, #tpu.memory_space<vmem>>, vector<8x8xf32>,
    %127 = vector.extract_strided_slice %44 {offsets = [8, 8], sizes = [8, 8], strides = [1, 1]} : vector<16x96xf32> to vector<8x8xf32>
    %128 = vector.extract_strided_slice %44 {offsets = [8, 40], sizes = [8, 8], strides = [1, 1]} : vector<16x96xf32> to vector<8x8xf32>
    %129 = vector.extract_strided_slice %44 {offsets = [8, 72], sizes = [8, 8], strides = [1, 1]} : vector<16x96xf32> to vector<8x8xf32>
    "tpu.trace_start"() <{level = 10 : i32, message = "qd,kd->qk"}> : () -> ()
    %cst_52 = arith.constant dense<0.000000e+00> : vector<8x8xf32>
    %130 = tpu.matmul %127, %128, %cst_52 {dimension_numbers = #tpu.dot_dimension_numbers<[1], [1], [0], [0], [0, 0, 1, 0], [], []>} : vector<8x8xf32>, vector<8x8xf32>, vector<8x8xf32> -> vector<8x8xf32>
    "tpu.trace_stop"() : () -> ()
    %cst_53 = arith.constant 0.353553385 : f32
    %131 = vector.broadcast %cst_53 : f32 to vector<8x8xf32>
    %132 = arith.mulf %130, %131 : vector<8x8xf32>
    %133 = vector.broadcast %110 : vector<1x8xf32> to vector<8x8xf32>
    %134 = arith.addf %132, %133 : vector<8x8xf32>
    %135 = math.exp %134 : vector<8x8xf32>
    %cst_54 = arith.constant dense<0.000000e+00> : vector<8xf32>
    %136 = vector.multi_reduction <add>, %135, %cst_54 [1] : vector<8x8xf32> to vector<8xf32>
    %137 = vector.shape_cast %136 : vector<8xf32> to vector<8x1xf32>
    %138 = tpu.reciprocal %137 {approx = true} : vector<8x1xf32> -> vector<8x1xf32>
    %139 = vector.broadcast %138 : vector<8x1xf32> to vector<8x8xf32>
    %140 = arith.mulf %135, %139 : vector<8x8xf32>
    %cst_55 = arith.constant dense<0.000000e+00> : vector<8x8xf32>
    %141 = tpu.matmul %140, %129, %cst_55 {dimension_numbers = #tpu.dot_dimension_numbers<[1], [0], [0], [1], [0, 0, 1, 1], [], []>} : vector<8x8xf32>, vector<8x8xf32>, vector<8x8xf32> -> vector<8x8xf32>
    %c8_56 = arith.constant 8 : index
    %c8_57 = arith.constant 8 : index
    %142 = vector.load %arg9[%c8_56, %c8_57] : memref<16x32xf32, #tpu.memory_space<vmem>>, vector<8x8xf32>
    tpu.vector_store %arg9[%c8_56, %c8_57], %141 {strides = array<i32>} : memref<16x32xf32, #tpu.memory_space<vmem>>, vector<8x8xf32>,
    %143 = vector.extract_strided_slice %44 {offsets = [8, 16], sizes = [8, 8], strides = [1, 1]} : vector<16x96xf32> to vector<8x8xf32>
    %144 = vector.extract_strided_slice %44 {offsets = [8, 48], sizes = [8, 8], strides = [1, 1]} : vector<16x96xf32> to vector<8x8xf32>
    %145 = vector.extract_strided_slice %44 {offsets = [8, 80], sizes = [8, 8], strides = [1, 1]} : vector<16x96xf32> to vector<8x8xf32>
    "tpu.trace_start"() <{level = 10 : i32, message = "qd,kd->qk"}> : () -> ()
    %cst_58 = arith.constant dense<0.000000e+00> : vector<8x8xf32>
    %146 = tpu.matmul %143, %144, %cst_58 {dimension_numbers = #tpu.dot_dimension_numbers<[1], [1], [0], [0], [0, 0, 1, 0], [], []>} : vector<8x8xf32>, vector<8x8xf32>, vector<8x8xf32> -> vector<8x8xf32>
    "tpu.trace_stop"() : () -> ()
    %cst_59 = arith.constant 0.353553385 : f32
    %147 = vector.broadcast %cst_59 : f32 to vector<8x8xf32>
    %148 = arith.mulf %146, %147 : vector<8x8xf32>
    %149 = vector.broadcast %110 : vector<1x8xf32> to vector<8x8xf32>
    %150 = arith.addf %148, %149 : vector<8x8xf32>
    %151 = math.exp %150 : vector<8x8xf32>
    %cst_60 = arith.constant dense<0.000000e+00> : vector<8xf32>
    %152 = vector.multi_reduction <add>, %151, %cst_60 [1] : vector<8x8xf32> to vector<8xf32>
    %153 = vector.shape_cast %152 : vector<8xf32> to vector<8x1xf32>
    %154 = tpu.reciprocal %153 {approx = true} : vector<8x1xf32> -> vector<8x1xf32>
    %155 = vector.broadcast %154 : vector<8x1xf32> to vector<8x8xf32>
    %156 = arith.mulf %151, %155 : vector<8x8xf32>
    %cst_61 = arith.constant dense<0.000000e+00> : vector<8x8xf32>
    %157 = tpu.matmul %156, %145, %cst_61 {dimension_numbers = #tpu.dot_dimension_numbers<[1], [0], [0], [1], [0, 0, 1, 1], [], []>} : vector<8x8xf32>, vector<8x8xf32>, vector<8x8xf32> -> vector<8x8xf32>
    %c8_62 = arith.constant 8 : index
    %c16_63 = arith.constant 16 : index
    %158 = vector.load %arg9[%c8_62, %c16_63] : memref<16x32xf32, #tpu.memory_space<vmem>>, vector<8x8xf32>
    tpu.vector_store %arg9[%c8_62, %c16_63], %157 {strides = array<i32>} : memref<16x32xf32, #tpu.memory_space<vmem>>, vector<8x8xf32>,
    %159 = vector.extract_strided_slice %44 {offsets = [8, 24], sizes = [8, 8], strides = [1, 1]} : vector<16x96xf32> to vector<8x8xf32>
    %160 = vector.extract_strided_slice %44 {offsets = [8, 56], sizes = [8, 8], strides = [1, 1]} : vector<16x96xf32> to vector<8x8xf32>
    %161 = vector.extract_strided_slice %44 {offsets = [8, 88], sizes = [8, 8], strides = [1, 1]} : vector<16x96xf32> to vector<8x8xf32>
    "tpu.trace_start"() <{level = 10 : i32, message = "qd,kd->qk"}> : () -> ()
    %cst_64 = arith.constant dense<0.000000e+00> : vector<8x8xf32>
    %162 = tpu.matmul %159, %160, %cst_64 {dimension_numbers = #tpu.dot_dimension_numbers<[1], [1], [0], [0], [0, 0, 1, 0], [], []>} : vector<8x8xf32>, vector<8x8xf32>, vector<8x8xf32> -> vector<8x8xf32>
    "tpu.trace_stop"() : () -> ()
    %cst_65 = arith.constant 0.353553385 : f32
    %163 = vector.broadcast %cst_65 : f32 to vector<8x8xf32>
    %164 = arith.mulf %162, %163 : vector<8x8xf32>
    %165 = vector.broadcast %110 : vector<1x8xf32> to vector<8x8xf32>
    %166 = arith.addf %164, %165 : vector<8x8xf32>
    %167 = math.exp %166 : vector<8x8xf32>
    %cst_66 = arith.constant dense<0.000000e+00> : vector<8xf32>
    %168 = vector.multi_reduction <add>, %167, %cst_66 [1] : vector<8x8xf32> to vector<8xf32>
    %169 = vector.shape_cast %168 : vector<8xf32> to vector<8x1xf32>
    %170 = tpu.reciprocal %169 {approx = true} : vector<8x1xf32> -> vector<8x1xf32>
    %171 = vector.broadcast %170 : vector<8x1xf32> to vector<8x8xf32>
    %172 = arith.mulf %167, %171 : vector<8x8xf32>
    %cst_67 = arith.constant dense<0.000000e+00> : vector<8x8xf32>
    %173 = tpu.matmul %172, %161, %cst_67 {dimension_numbers = #tpu.dot_dimension_numbers<[1], [0], [0], [1], [0, 0, 1, 1], [], []>} : vector<8x8xf32>, vector<8x8xf32>, vector<8x8xf32> -> vector<8x8xf32>
    %c8_68 = arith.constant 8 : index
    %c24_69 = arith.constant 24 : index
    %174 = vector.load %arg9[%c8_68, %c24_69] : memref<16x32xf32, #tpu.memory_space<vmem>>, vector<8x8xf32>
    tpu.vector_store %arg9[%c8_68, %c24_69], %173 {strides = array<i32>} : memref<16x32xf32, #tpu.memory_space<vmem>>, vector<8x8xf32>,
    %c0_70 = arith.constant 0 : index
    %c0_71 = arith.constant 0 : index
    %175 = vector.load %arg9[%c0_70, %c0_71] : memref<16x32xf32, #tpu.memory_space<vmem>>, vector<16x32xf32>
    %176 = arith.truncf %175 : vector<16x32xf32> to vector<16x32xbf16>
    %c0_72 = arith.constant 0 : index
    %c0_73 = arith.constant 0 : index
    %c0_74 = arith.constant 0 : index
    %177 = vector.load %arg5[%c0_72, %c0_73, %c0_74] : memref<2x32x32xbf16, #tpu.memory_space<vmem>>, vector<1x32x32xbf16>
    %178 = vector.shape_cast %177 : vector<1x32x32xbf16> to vector<32x32xbf16>
    %cst_75 = arith.constant dense<0.000000e+00> : vector<16x32xf32>
    %179 = tpu.matmul %176, %178, %cst_75 {dimension_numbers = #tpu.dot_dimension_numbers<[1], [0], [0], [1], [0, 0, 1, 1], [], []>} : vector<16x32xbf16>, vector<32x32xbf16>, vector<16x32xf32> -> vector<16x32xf32>
    %180 = vector.broadcast %32 : vector<1x32xf32> to vector<16x32xf32>
    %181 = arith.addf %179, %180 : vector<16x32xf32>
    %182 = arith.addf %30, %181 : vector<16x32xf32>
    %cst_76 = arith.constant dense<0.000000e+00> : vector<16xf32>
    %183 = vector.multi_reduction <add>, %182, %cst_76 [1] : vector<16x32xf32> to vector<16xf32>
    %184 = vector.shape_cast %183 : vector<16xf32> to vector<16x1xf32>
    %cst_77 = arith.constant 3.200000e+01 : f32
    %185 = vector.broadcast %cst_77 : f32 to vector<16x1xf32>
    %186 = arith.divf %184, %185 : vector<16x1xf32>
    %187 = vector.broadcast %186 : vector<16x1xf32> to vector<16x32xf32>
    %188 = arith.subf %182, %187 : vector<16x32xf32>
    %189 = arith.mulf %188, %188 : vector<16x32xf32>
    %cst_78 = arith.constant dense<0.000000e+00> : vector<16xf32>
    %190 = vector.multi_reduction <add>, %189, %cst_78 [1] : vector<16x32xf32> to vector<16xf32>
    %191 = vector.shape_cast %190 : vector<16xf32> to vector<16x1xf32>
    %cst_79 = arith.constant 3.200000e+01 : f32
    %192 = vector.broadcast %cst_79 : f32 to vector<16x1xf32>
    %193 = arith.divf %191, %192 : vector<16x1xf32>
    %194 = vector.broadcast %186 : vector<16x1xf32> to vector<16x32xf32>
    %195 = arith.subf %182, %194 : vector<16x32xf32>
    %cst_80 = arith.constant 9.99999996E-13 : f32
    %196 = vector.broadcast %cst_80 : f32 to vector<16x1xf32>
    %197 = arith.addf %193, %196 : vector<16x1xf32>
    %198 = math.rsqrt %197 : vector<16x1xf32>
    %199 = vector.broadcast %198 : vector<16x1xf32> to vector<16x32xf32>
    %200 = arith.mulf %195, %199 : vector<16x32xf32>
    %201 = vector.broadcast %35 : vector<1x32xf32> to vector<16x32xf32>
    %202 = arith.mulf %200, %201 : vector<16x32xf32>
    %203 = vector.broadcast %36 : vector<1x32xf32> to vector<16x32xf32>
    %204 = arith.addf %202, %203 : vector<16x32xf32>
    %205 = arith.truncf %204 : vector<16x32xf32> to vector<16x32xbf16>
    %c0_81 = arith.constant 0 : index
    %c0_82 = arith.constant 0 : index
    %c0_83 = arith.constant 0 : index
    %206 = vector.load %arg6[%c0_81, %c0_82, %c0_83] : memref<2x32x64xbf16, #tpu.memory_space<vmem>>, vector<1x32x64xbf16>
    %207 = vector.shape_cast %206 : vector<1x32x64xbf16> to vector<32x64xbf16>
    %cst_84 = arith.constant dense<0.000000e+00> : vector<16x64xf32>
    %208 = tpu.matmul %205, %207, %cst_84 {dimension_numbers = #tpu.dot_dimension_numbers<[1], [0], [0], [1], [0, 0, 1, 1], [], []>} : vector<16x32xbf16>, vector<32x64xbf16>, vector<16x64xf32> -> vector<16x64xf32>
    %209 = vector.broadcast %33 : vector<1x64xf32> to vector<16x64xf32>
    %210 = arith.addf %208, %209 : vector<16x64xf32>
    %211 = arith.mulf %210, %210 : vector<16x64xf32>
    %212 = arith.mulf %210, %211 : vector<16x64xf32>
    %cst_85 = arith.constant 4.471500e-02 : f32
    %213 = vector.broadcast %cst_85 : f32 to vector<16x64xf32>
    %214 = arith.mulf %213, %212 : vector<16x64xf32>
    %215 = arith.addf %210, %214 : vector<16x64xf32>
    %cst_86 = arith.constant 0.797884583 : f32
    %216 = vector.broadcast %cst_86 : f32 to vector<16x64xf32>
    %217 = arith.mulf %216, %215 : vector<16x64xf32>
    %218 = math.tanh %217 : vector<16x64xf32>
    %cst_87 = arith.constant 1.000000e+00 : f32
    %219 = vector.broadcast %cst_87 : f32 to vector<16x64xf32>
    %220 = arith.addf %219, %218 : vector<16x64xf32>
    %cst_88 = arith.constant 5.000000e-01 : f32
    %221 = vector.broadcast %cst_88 : f32 to vector<16x64xf32>
    %222 = arith.mulf %221, %220 : vector<16x64xf32>
    %223 = arith.mulf %210, %222 : vector<16x64xf32>
    %224 = arith.truncf %223 : vector<16x64xf32> to vector<16x64xbf16>
    %c0_89 = arith.constant 0 : index
    %c0_90 = arith.constant 0 : index
    %c0_91 = arith.constant 0 : index
    %225 = vector.load %arg7[%c0_89, %c0_90, %c0_91] : memref<2x64x32xbf16, #tpu.memory_space<vmem>>, vector<1x64x32xbf16>
    %226 = vector.shape_cast %225 : vector<1x64x32xbf16> to vector<64x32xbf16>
    %cst_92 = arith.constant dense<0.000000e+00> : vector<16x32xf32>
    %227 = tpu.matmul %224, %226, %cst_92 {dimension_numbers = #tpu.dot_dimension_numbers<[1], [0], [0], [1], [0, 0, 1, 1], [], []>} : vector<16x64xbf16>, vector<64x32xbf16>, vector<16x32xf32> -> vector<16x32xf32>
    %228 = vector.broadcast %34 : vector<1x32xf32> to vector<16x32xf32>
    %229 = arith.addf %227, %228 : vector<16x32xf32>
    %230 = arith.addf %204, %229 : vector<16x32xf32>
    %cst_93 = arith.constant dense<0.000000e+00> : vector<16xf32>
    %231 = vector.multi_reduction <add>, %230, %cst_93 [1] : vector<16x32xf32> to vector<16xf32>
    %232 = vector.shape_cast %231 : vector<16xf32> to vector<16x1xf32>
    %cst_94 = arith.constant 3.200000e+01 : f32
    %233 = vector.broadcast %cst_94 : f32 to vector<16x1xf32>
    %234 = arith.divf %232, %233 : vector<16x1xf32>
    %235 = vector.broadcast %234 : vector<16x1xf32> to vector<16x32xf32>
    %236 = arith.subf %230, %235 : vector<16x32xf32>
    %237 = arith.mulf %236, %236 : vector<16x32xf32>
    %cst_95 = arith.constant dense<0.000000e+00> : vector<16xf32>
    %238 = vector.multi_reduction <add>, %237, %cst_95 [1] : vector<16x32xf32> to vector<16xf32>
    %239 = vector.shape_cast %238 : vector<16xf32> to vector<16x1xf32>
    %cst_96 = arith.constant 3.200000e+01 : f32
    %240 = vector.broadcast %cst_96 : f32 to vector<16x1xf32>
    %241 = arith.divf %239, %240 : vector<16x1xf32>
    %242 = vector.broadcast %234 : vector<16x1xf32> to vector<16x32xf32>
    %243 = arith.subf %230, %242 : vector<16x32xf32>
    %cst_97 = arith.constant 9.99999996E-13 : f32
    %244 = vector.broadcast %cst_97 : f32 to vector<16x1xf32>
    %245 = arith.addf %241, %244 : vector<16x1xf32>
    %246 = math.rsqrt %245 : vector<16x1xf32>
    %247 = vector.broadcast %246 : vector<16x1xf32> to vector<16x32xf32>
    %248 = arith.mulf %243, %247 : vector<16x32xf32>
    %249 = vector.broadcast %37 : vector<1x32xf32> to vector<16x32xf32>
    %250 = arith.mulf %248, %249 : vector<16x32xf32>
    %251 = vector.broadcast %38 : vector<1x32xf32> to vector<16x32xf32>
    %252 = arith.addf %250, %251 : vector<16x32xf32>
    %c10 = arith.constant 10 : index
    %c0_98 = arith.constant 0 : index
    %253 = vector.load %arg3[%c10, %c0_98] : memref<24x128xf32, #tpu.memory_space<vmem>>, vector<1x96xf32>
    %c11 = arith.constant 11 : index
    %c0_99 = arith.constant 0 : index
    %254 = vector.load %arg3[%c11, %c0_99] : memref<24x128xf32, #tpu.memory_space<vmem>>, vector<1x32xf32>
    %c12 = arith.constant 12 : index
    %c0_100 = arith.constant 0 : index
    %255 = vector.load %arg3[%c12, %c0_100] : memref<24x128xf32, #tpu.memory_space<vmem>>, vector<1x64xf32>
    %c13 = arith.constant 13 : index
    %c0_101 = arith.constant 0 : index
    %256 = vector.load %arg3[%c13, %c0_101] : memref<24x128xf32, #tpu.memory_space<vmem>>, vector<1x32xf32>
    %c14 = arith.constant 14 : index
    %c0_102 = arith.constant 0 : index
    %257 = vector.load %arg3[%c14, %c0_102] : memref<24x128xf32, #tpu.memory_space<vmem>>, vector<1x32xf32>
    %c15 = arith.constant 15 : index
    %c0_103 = arith.constant 0 : index
    %258 = vector.load %arg3[%c15, %c0_103] : memref<24x128xf32, #tpu.memory_space<vmem>>, vector<1x32xf32>
    %c16_104 = arith.constant 16 : index
    %c0_105 = arith.constant 0 : index
    %259 = vector.load %arg3[%c16_104, %c0_105] : memref<24x128xf32, #tpu.memory_space<vmem>>, vector<1x32xf32>
    %c17 = arith.constant 17 : index
    %c0_106 = arith.constant 0 : index
    %260 = vector.load %arg3[%c17, %c0_106] : memref<24x128xf32, #tpu.memory_space<vmem>>, vector<1x32xf32>
    %261 = arith.truncf %252 : vector<16x32xf32> to vector<16x32xbf16>
    %c1_107 = arith.constant 1 : index
    %c0_108 = arith.constant 0 : index
    %c0_109 = arith.constant 0 : index
    %262 = vector.load %arg4[%c1_107, %c0_108, %c0_109] : memref<2x32x96xbf16, #tpu.memory_space<vmem>>, vector<1x32x96xbf16>
    %263 = vector.shape_cast %262 : vector<1x32x96xbf16> to vector<32x96xbf16>
    %cst_110 = arith.constant dense<0.000000e+00> : vector<16x96xf32>
    %264 = tpu.matmul %261, %263, %cst_110 {dimension_numbers = #tpu.dot_dimension_numbers<[1], [0], [0], [1], [0, 0, 1, 1], [], []>} : vector<16x32xbf16>, vector<32x96xbf16>, vector<16x96xf32> -> vector<16x96xf32>
    %265 = vector.broadcast %253 : vector<1x96xf32> to vector<16x96xf32>
    %266 = arith.addf %264, %265 : vector<16x96xf32>
    %267 = vector.extract_strided_slice %6 {offsets = [0, 0], sizes = [1, 8], strides = [1, 1]} : vector<2x8xf32> to vector<1x8xf32>
    %268 = vector.extract_strided_slice %266 {offsets = [0, 0], sizes = [8, 8], strides = [1, 1]} : vector<16x96xf32> to vector<8x8xf32>
    %269 = vector.extract_strided_slice %266 {offsets = [0, 32], sizes = [8, 8], strides = [1, 1]} : vector<16x96xf32> to vector<8x8xf32>
    %270 = vector.extract_strided_slice %266 {offsets = [0, 64], sizes = [8, 8], strides = [1, 1]} : vector<16x96xf32> to vector<8x8xf32>
    "tpu.trace_start"() <{level = 10 : i32, message = "qd,kd->qk"}> : () -> ()
    %cst_111 = arith.constant dense<0.000000e+00> : vector<8x8xf32>
    %271 = tpu.matmul %268, %269, %cst_111 {dimension_numbers = #tpu.dot_dimension_numbers<[1], [1], [0], [0], [0, 0, 1, 0], [], []>} : vector<8x8xf32>, vector<8x8xf32>, vector<8x8xf32> -> vector<8x8xf32>
    "tpu.trace_stop"() : () -> ()
    %cst_112 = arith.constant 0.353553385 : f32
    %272 = vector.broadcast %cst_112 : f32 to vector<8x8xf32>
    %273 = arith.mulf %271, %272 : vector<8x8xf32>
    %274 = vector.broadcast %267 : vector<1x8xf32> to vector<8x8xf32>
    %275 = arith.addf %273, %274 : vector<8x8xf32>
    %276 = math.exp %275 : vector<8x8xf32>
    %cst_113 = arith.constant dense<0.000000e+00> : vector<8xf32>
    %277 = vector.multi_reduction <add>, %276, %cst_113 [1] : vector<8x8xf32> to vector<8xf32>
    %278 = vector.shape_cast %277 : vector<8xf32> to vector<8x1xf32>
    %279 = tpu.reciprocal %278 {approx = true} : vector<8x1xf32> -> vector<8x1xf32>
    %280 = vector.broadcast %279 : vector<8x1xf32> to vector<8x8xf32>
    %281 = arith.mulf %276, %280 : vector<8x8xf32>
    %cst_114 = arith.constant dense<0.000000e+00> : vector<8x8xf32>
    %282 = tpu.matmul %281, %270, %cst_114 {dimension_numbers = #tpu.dot_dimension_numbers<[1], [0], [0], [1], [0, 0, 1, 1], [], []>} : vector<8x8xf32>, vector<8x8xf32>, vector<8x8xf32> -> vector<8x8xf32>
    %c0_115 = arith.constant 0 : index
    %c0_116 = arith.constant 0 : index
    %283 = vector.load %arg9[%c0_115, %c0_116] : memref<16x32xf32, #tpu.memory_space<vmem>>, vector<8x8xf32>
    tpu.vector_store %arg9[%c0_115, %c0_116], %282 {strides = array<i32>} : memref<16x32xf32, #tpu.memory_space<vmem>>, vector<8x8xf32>,
    %284 = vector.extract_strided_slice %266 {offsets = [0, 8], sizes = [8, 8], strides = [1, 1]} : vector<16x96xf32> to vector<8x8xf32>
    %285 = vector.extract_strided_slice %266 {offsets = [0, 40], sizes = [8, 8], strides = [1, 1]} : vector<16x96xf32> to vector<8x8xf32>
    %286 = vector.extract_strided_slice %266 {offsets = [0, 72], sizes = [8, 8], strides = [1, 1]} : vector<16x96xf32> to vector<8x8xf32>
    "tpu.trace_start"() <{level = 10 : i32, message = "qd,kd->qk"}> : () -> ()
    %cst_117 = arith.constant dense<0.000000e+00> : vector<8x8xf32>
    %287 = tpu.matmul %284, %285, %cst_117 {dimension_numbers = #tpu.dot_dimension_numbers<[1], [1], [0], [0], [0, 0, 1, 0], [], []>} : vector<8x8xf32>, vector<8x8xf32>, vector<8x8xf32> -> vector<8x8xf32>
    "tpu.trace_stop"() : () -> ()
    %cst_118 = arith.constant 0.353553385 : f32
    %288 = vector.broadcast %cst_118 : f32 to vector<8x8xf32>
    %289 = arith.mulf %287, %288 : vector<8x8xf32>
    %290 = vector.broadcast %267 : vector<1x8xf32> to vector<8x8xf32>
    %291 = arith.addf %289, %290 : vector<8x8xf32>
    %292 = math.exp %291 : vector<8x8xf32>
    %cst_119 = arith.constant dense<0.000000e+00> : vector<8xf32>
    %293 = vector.multi_reduction <add>, %292, %cst_119 [1] : vector<8x8xf32> to vector<8xf32>
    %294 = vector.shape_cast %293 : vector<8xf32> to vector<8x1xf32>
    %295 = tpu.reciprocal %294 {approx = true} : vector<8x1xf32> -> vector<8x1xf32>
    %296 = vector.broadcast %295 : vector<8x1xf32> to vector<8x8xf32>
    %297 = arith.mulf %292, %296 : vector<8x8xf32>
    %cst_120 = arith.constant dense<0.000000e+00> : vector<8x8xf32>
    %298 = tpu.matmul %297, %286, %cst_120 {dimension_numbers = #tpu.dot_dimension_numbers<[1], [0], [0], [1], [0, 0, 1, 1], [], []>} : vector<8x8xf32>, vector<8x8xf32>, vector<8x8xf32> -> vector<8x8xf32>
    %c0_121 = arith.constant 0 : index
    %c8_122 = arith.constant 8 : index
    %299 = vector.load %arg9[%c0_121, %c8_122] : memref<16x32xf32, #tpu.memory_space<vmem>>, vector<8x8xf32>
    tpu.vector_store %arg9[%c0_121, %c8_122], %298 {strides = array<i32>} : memref<16x32xf32, #tpu.memory_space<vmem>>, vector<8x8xf32>,
    %300 = vector.extract_strided_slice %266 {offsets = [0, 16], sizes = [8, 8], strides = [1, 1]} : vector<16x96xf32> to vector<8x8xf32>
    %301 = vector.extract_strided_slice %266 {offsets = [0, 48], sizes = [8, 8], strides = [1, 1]} : vector<16x96xf32> to vector<8x8xf32>
    %302 = vector.extract_strided_slice %266 {offsets = [0, 80], sizes = [8, 8], strides = [1, 1]} : vector<16x96xf32> to vector<8x8xf32>
    "tpu.trace_start"() <{level = 10 : i32, message = "qd,kd->qk"}> : () -> ()
    %cst_123 = arith.constant dense<0.000000e+00> : vector<8x8xf32>
    %303 = tpu.matmul %300, %301, %cst_123 {dimension_numbers = #tpu.dot_dimension_numbers<[1], [1], [0], [0], [0, 0, 1, 0], [], []>} : vector<8x8xf32>, vector<8x8xf32>, vector<8x8xf32> -> vector<8x8xf32>
    "tpu.trace_stop"() : () -> ()
    %cst_124 = arith.constant 0.353553385 : f32
    %304 = vector.broadcast %cst_124 : f32 to vector<8x8xf32>
    %305 = arith.mulf %303, %304 : vector<8x8xf32>
    %306 = vector.broadcast %267 : vector<1x8xf32> to vector<8x8xf32>
    %307 = arith.addf %305, %306 : vector<8x8xf32>
    %308 = math.exp %307 : vector<8x8xf32>
    %cst_125 = arith.constant dense<0.000000e+00> : vector<8xf32>
    %309 = vector.multi_reduction <add>, %308, %cst_125 [1] : vector<8x8xf32> to vector<8xf32>
    %310 = vector.shape_cast %309 : vector<8xf32> to vector<8x1xf32>
    %311 = tpu.reciprocal %310 {approx = true} : vector<8x1xf32> -> vector<8x1xf32>
    %312 = vector.broadcast %311 : vector<8x1xf32> to vector<8x8xf32>
    %313 = arith.mulf %308, %312 : vector<8x8xf32>
    %cst_126 = arith.constant dense<0.000000e+00> : vector<8x8xf32>
    %314 = tpu.matmul %313, %302, %cst_126 {dimension_numbers = #tpu.dot_dimension_numbers<[1], [0], [0], [1], [0, 0, 1, 1], [], []>} : vector<8x8xf32>, vector<8x8xf32>, vector<8x8xf32> -> vector<8x8xf32>
    %c0_127 = arith.constant 0 : index
    %c16_128 = arith.constant 16 : index
    %315 = vector.load %arg9[%c0_127, %c16_128] : memref<16x32xf32, #tpu.memory_space<vmem>>, vector<8x8xf32>
    tpu.vector_store %arg9[%c0_127, %c16_128], %314 {strides = array<i32>} : memref<16x32xf32, #tpu.memory_space<vmem>>, vector<8x8xf32>,
    %316 = vector.extract_strided_slice %266 {offsets = [0, 24], sizes = [8, 8], strides = [1, 1]} : vector<16x96xf32> to vector<8x8xf32>
    %317 = vector.extract_strided_slice %266 {offsets = [0, 56], sizes = [8, 8], strides = [1, 1]} : vector<16x96xf32> to vector<8x8xf32>
    %318 = vector.extract_strided_slice %266 {offsets = [0, 88], sizes = [8, 8], strides = [1, 1]} : vector<16x96xf32> to vector<8x8xf32>
    "tpu.trace_start"() <{level = 10 : i32, message = "qd,kd->qk"}> : () -> ()
    %cst_129 = arith.constant dense<0.000000e+00> : vector<8x8xf32>
    %319 = tpu.matmul %316, %317, %cst_129 {dimension_numbers = #tpu.dot_dimension_numbers<[1], [1], [0], [0], [0, 0, 1, 0], [], []>} : vector<8x8xf32>, vector<8x8xf32>, vector<8x8xf32> -> vector<8x8xf32>
    "tpu.trace_stop"() : () -> ()
    %cst_130 = arith.constant 0.353553385 : f32
    %320 = vector.broadcast %cst_130 : f32 to vector<8x8xf32>
    %321 = arith.mulf %319, %320 : vector<8x8xf32>
    %322 = vector.broadcast %267 : vector<1x8xf32> to vector<8x8xf32>
    %323 = arith.addf %321, %322 : vector<8x8xf32>
    %324 = math.exp %323 : vector<8x8xf32>
    %cst_131 = arith.constant dense<0.000000e+00> : vector<8xf32>
    %325 = vector.multi_reduction <add>, %324, %cst_131 [1] : vector<8x8xf32> to vector<8xf32>
    %326 = vector.shape_cast %325 : vector<8xf32> to vector<8x1xf32>
    %327 = tpu.reciprocal %326 {approx = true} : vector<8x1xf32> -> vector<8x1xf32>
    %328 = vector.broadcast %327 : vector<8x1xf32> to vector<8x8xf32>
    %329 = arith.mulf %324, %328 : vector<8x8xf32>
    %cst_132 = arith.constant dense<0.000000e+00> : vector<8x8xf32>
    %330 = tpu.matmul %329, %318, %cst_132 {dimension_numbers = #tpu.dot_dimension_numbers<[1], [0], [0], [1], [0, 0, 1, 1], [], []>} : vector<8x8xf32>, vector<8x8xf32>, vector<8x8xf32> -> vector<8x8xf32>
    %c0_133 = arith.constant 0 : index
    %c24_134 = arith.constant 24 : index
    %331 = vector.load %arg9[%c0_133, %c24_134] : memref<16x32xf32, #tpu.memory_space<vmem>>, vector<8x8xf32>
    tpu.vector_store %arg9[%c0_133, %c24_134], %330 {strides = array<i32>} : memref<16x32xf32, #tpu.memory_space<vmem>>, vector<8x8xf32>,
    %332 = vector.extract_strided_slice %6 {offsets = [1, 0], sizes = [1, 8], strides = [1, 1]} : vector<2x8xf32> to vector<1x8xf32>
    %333 = vector.extract_strided_slice %266 {offsets = [8, 0], sizes = [8, 8], strides = [1, 1]} : vector<16x96xf32> to vector<8x8xf32>
    %334 = vector.extract_strided_slice %266 {offsets = [8, 32], sizes = [8, 8], strides = [1, 1]} : vector<16x96xf32> to vector<8x8xf32>
    %335 = vector.extract_strided_slice %266 {offsets = [8, 64], sizes = [8, 8], strides = [1, 1]} : vector<16x96xf32> to vector<8x8xf32>
    "tpu.trace_start"() <{level = 10 : i32, message = "qd,kd->qk"}> : () -> ()
    %cst_135 = arith.constant dense<0.000000e+00> : vector<8x8xf32>
    %336 = tpu.matmul %333, %334, %cst_135 {dimension_numbers = #tpu.dot_dimension_numbers<[1], [1], [0], [0], [0, 0, 1, 0], [], []>} : vector<8x8xf32>, vector<8x8xf32>, vector<8x8xf32> -> vector<8x8xf32>
    "tpu.trace_stop"() : () -> ()
    %cst_136 = arith.constant 0.353553385 : f32
    %337 = vector.broadcast %cst_136 : f32 to vector<8x8xf32>
    %338 = arith.mulf %336, %337 : vector<8x8xf32>
    %339 = vector.broadcast %332 : vector<1x8xf32> to vector<8x8xf32>
    %340 = arith.addf %338, %339 : vector<8x8xf32>
    %341 = math.exp %340 : vector<8x8xf32>
    %cst_137 = arith.constant dense<0.000000e+00> : vector<8xf32>
    %342 = vector.multi_reduction <add>, %341, %cst_137 [1] : vector<8x8xf32> to vector<8xf32>
    %343 = vector.shape_cast %342 : vector<8xf32> to vector<8x1xf32>
    %344 = tpu.reciprocal %343 {approx = true} : vector<8x1xf32> -> vector<8x1xf32>
    %345 = vector.broadcast %344 : vector<8x1xf32> to vector<8x8xf32>
    %346 = arith.mulf %341, %345 : vector<8x8xf32>
    %cst_138 = arith.constant dense<0.000000e+00> : vector<8x8xf32>
    %347 = tpu.matmul %346, %335, %cst_138 {dimension_numbers = #tpu.dot_dimension_numbers<[1], [0], [0], [1], [0, 0, 1, 1], [], []>} : vector<8x8xf32>, vector<8x8xf32>, vector<8x8xf32> -> vector<8x8xf32>
    %c8_139 = arith.constant 8 : index
    %c0_140 = arith.constant 0 : index
    %348 = vector.load %arg9[%c8_139, %c0_140] : memref<16x32xf32, #tpu.memory_space<vmem>>, vector<8x8xf32>
    tpu.vector_store %arg9[%c8_139, %c0_140], %347 {strides = array<i32>} : memref<16x32xf32, #tpu.memory_space<vmem>>, vector<8x8xf32>,
    %349 = vector.extract_strided_slice %266 {offsets = [8, 8], sizes = [8, 8], strides = [1, 1]} : vector<16x96xf32> to vector<8x8xf32>
    %350 = vector.extract_strided_slice %266 {offsets = [8, 40], sizes = [8, 8], strides = [1, 1]} : vector<16x96xf32> to vector<8x8xf32>
    %351 = vector.extract_strided_slice %266 {offsets = [8, 72], sizes = [8, 8], strides = [1, 1]} : vector<16x96xf32> to vector<8x8xf32>
    "tpu.trace_start"() <{level = 10 : i32, message = "qd,kd->qk"}> : () -> ()
    %cst_141 = arith.constant dense<0.000000e+00> : vector<8x8xf32>
    %352 = tpu.matmul %349, %350, %cst_141 {dimension_numbers = #tpu.dot_dimension_numbers<[1], [1], [0], [0], [0, 0, 1, 0], [], []>} : vector<8x8xf32>, vector<8x8xf32>, vector<8x8xf32> -> vector<8x8xf32>
    "tpu.trace_stop"() : () -> ()
    %cst_142 = arith.constant 0.353553385 : f32
    %353 = vector.broadcast %cst_142 : f32 to vector<8x8xf32>
    %354 = arith.mulf %352, %353 : vector<8x8xf32>
    %355 = vector.broadcast %332 : vector<1x8xf32> to vector<8x8xf32>
    %356 = arith.addf %354, %355 : vector<8x8xf32>
    %357 = math.exp %356 : vector<8x8xf32>
    %cst_143 = arith.constant dense<0.000000e+00> : vector<8xf32>
    %358 = vector.multi_reduction <add>, %357, %cst_143 [1] : vector<8x8xf32> to vector<8xf32>
    %359 = vector.shape_cast %358 : vector<8xf32> to vector<8x1xf32>
    %360 = tpu.reciprocal %359 {approx = true} : vector<8x1xf32> -> vector<8x1xf32>
    %361 = vector.broadcast %360 : vector<8x1xf32> to vector<8x8xf32>
    %362 = arith.mulf %357, %361 : vector<8x8xf32>
    %cst_144 = arith.constant dense<0.000000e+00> : vector<8x8xf32>
    %363 = tpu.matmul %362, %351, %cst_144 {dimension_numbers = #tpu.dot_dimension_numbers<[1], [0], [0], [1], [0, 0, 1, 1], [], []>} : vector<8x8xf32>, vector<8x8xf32>, vector<8x8xf32> -> vector<8x8xf32>
    %c8_145 = arith.constant 8 : index
    %c8_146 = arith.constant 8 : index
    %364 = vector.load %arg9[%c8_145, %c8_146] : memref<16x32xf32, #tpu.memory_space<vmem>>, vector<8x8xf32>
    tpu.vector_store %arg9[%c8_145, %c8_146], %363 {strides = array<i32>} : memref<16x32xf32, #tpu.memory_space<vmem>>, vector<8x8xf32>,
    %365 = vector.extract_strided_slice %266 {offsets = [8, 16], sizes = [8, 8], strides = [1, 1]} : vector<16x96xf32> to vector<8x8xf32>
    %366 = vector.extract_strided_slice %266 {offsets = [8, 48], sizes = [8, 8], strides = [1, 1]} : vector<16x96xf32> to vector<8x8xf32>
    %367 = vector.extract_strided_slice %266 {offsets = [8, 80], sizes = [8, 8], strides = [1, 1]} : vector<16x96xf32> to vector<8x8xf32>
    "tpu.trace_start"() <{level = 10 : i32, message = "qd,kd->qk"}> : () -> ()
    %cst_147 = arith.constant dense<0.000000e+00> : vector<8x8xf32>
    %368 = tpu.matmul %365, %366, %cst_147 {dimension_numbers = #tpu.dot_dimension_numbers<[1], [1], [0], [0], [0, 0, 1, 0], [], []>} : vector<8x8xf32>, vector<8x8xf32>, vector<8x8xf32> -> vector<8x8xf32>
    "tpu.trace_stop"() : () -> ()
    %cst_148 = arith.constant 0.353553385 : f32
    %369 = vector.broadcast %cst_148 : f32 to vector<8x8xf32>
    %370 = arith.mulf %368, %369 : vector<8x8xf32>
    %371 = vector.broadcast %332 : vector<1x8xf32> to vector<8x8xf32>
    %372 = arith.addf %370, %371 : vector<8x8xf32>
    %373 = math.exp %372 : vector<8x8xf32>
    %cst_149 = arith.constant dense<0.000000e+00> : vector<8xf32>
    %374 = vector.multi_reduction <add>, %373, %cst_149 [1] : vector<8x8xf32> to vector<8xf32>
    %375 = vector.shape_cast %374 : vector<8xf32> to vector<8x1xf32>
    %376 = tpu.reciprocal %375 {approx = true} : vector<8x1xf32> -> vector<8x1xf32>
    %377 = vector.broadcast %376 : vector<8x1xf32> to vector<8x8xf32>
    %378 = arith.mulf %373, %377 : vector<8x8xf32>
    %cst_150 = arith.constant dense<0.000000e+00> : vector<8x8xf32>
    %379 = tpu.matmul %378, %367, %cst_150 {dimension_numbers = #tpu.dot_dimension_numbers<[1], [0], [0], [1], [0, 0, 1, 1], [], []>} : vector<8x8xf32>, vector<8x8xf32>, vector<8x8xf32> -> vector<8x8xf32>
    %c8_151 = arith.constant 8 : index
    %c16_152 = arith.constant 16 : index
    %380 = vector.load %arg9[%c8_151, %c16_152] : memref<16x32xf32, #tpu.memory_space<vmem>>, vector<8x8xf32>
    tpu.vector_store %arg9[%c8_151, %c16_152], %379 {strides = array<i32>} : memref<16x32xf32, #tpu.memory_space<vmem>>, vector<8x8xf32>,
    %381 = vector.extract_strided_slice %266 {offsets = [8, 24], sizes = [8, 8], strides = [1, 1]} : vector<16x96xf32> to vector<8x8xf32>
    %382 = vector.extract_strided_slice %266 {offsets = [8, 56], sizes = [8, 8], strides = [1, 1]} : vector<16x96xf32> to vector<8x8xf32>
    %383 = vector.extract_strided_slice %266 {offsets = [8, 88], sizes = [8, 8], strides = [1, 1]} : vector<16x96xf32> to vector<8x8xf32>
    "tpu.trace_start"() <{level = 10 : i32, message = "qd,kd->qk"}> : () -> ()
    %cst_153 = arith.constant dense<0.000000e+00> : vector<8x8xf32>
    %384 = tpu.matmul %381, %382, %cst_153 {dimension_numbers = #tpu.dot_dimension_numbers<[1], [1], [0], [0], [0, 0, 1, 0], [], []>} : vector<8x8xf32>, vector<8x8xf32>, vector<8x8xf32> -> vector<8x8xf32>
    "tpu.trace_stop"() : () -> ()
    %cst_154 = arith.constant 0.353553385 : f32
    %385 = vector.broadcast %cst_154 : f32 to vector<8x8xf32>
    %386 = arith.mulf %384, %385 : vector<8x8xf32>
    %387 = vector.broadcast %332 : vector<1x8xf32> to vector<8x8xf32>
    %388 = arith.addf %386, %387 : vector<8x8xf32>
    %389 = math.exp %388 : vector<8x8xf32>
    %cst_155 = arith.constant dense<0.000000e+00> : vector<8xf32>
    %390 = vector.multi_reduction <add>, %389, %cst_155 [1] : vector<8x8xf32> to vector<8xf32>
    %391 = vector.shape_cast %390 : vector<8xf32> to vector<8x1xf32>
    %392 = tpu.reciprocal %391 {approx = true} : vector<8x1xf32> -> vector<8x1xf32>
    %393 = vector.broadcast %392 : vector<8x1xf32> to vector<8x8xf32>
    %394 = arith.mulf %389, %393 : vector<8x8xf32>
    %cst_156 = arith.constant dense<0.000000e+00> : vector<8x8xf32>
    %395 = tpu.matmul %394, %383, %cst_156 {dimension_numbers = #tpu.dot_dimension_numbers<[1], [0], [0], [1], [0, 0, 1, 1], [], []>} : vector<8x8xf32>, vector<8x8xf32>, vector<8x8xf32> -> vector<8x8xf32>
    %c8_157 = arith.constant 8 : index
    %c24_158 = arith.constant 24 : index
    %396 = vector.load %arg9[%c8_157, %c24_158] : memref<16x32xf32, #tpu.memory_space<vmem>>, vector<8x8xf32>
    tpu.vector_store %arg9[%c8_157, %c24_158], %395 {strides = array<i32>} : memref<16x32xf32, #tpu.memory_space<vmem>>, vector<8x8xf32>,
    %c0_159 = arith.constant 0 : index
    %c0_160 = arith.constant 0 : index
    %397 = vector.load %arg9[%c0_159, %c0_160] : memref<16x32xf32, #tpu.memory_space<vmem>>, vector<16x32xf32>
    %398 = arith.truncf %397 : vector<16x32xf32> to vector<16x32xbf16>
    %c1_161 = arith.constant 1 : index
    %c0_162 = arith.constant 0 : index
    %c0_163 = arith.constant 0 : index
    %399 = vector.load %arg5[%c1_161, %c0_162, %c0_163] : memref<2x32x32xbf16, #tpu.memory_space<vmem>>, vector<1x32x32xbf16>
    %400 = vector.shape_cast %399 : vector<1x32x32xbf16> to vector<32x32xbf16>
    %cst_164 = arith.constant dense<0.000000e+00> : vector<16x32xf32>
    %401 = tpu.matmul %398, %400, %cst_164 {dimension_numbers = #tpu.dot_dimension_numbers<[1], [0], [0], [1], [0, 0, 1, 1], [], []>} : vector<16x32xbf16>, vector<32x32xbf16>, vector<16x32xf32> -> vector<16x32xf32>
    %402 = vector.broadcast %254 : vector<1x32xf32> to vector<16x32xf32>
    %403 = arith.addf %401, %402 : vector<16x32xf32>
    %404 = arith.addf %252, %403 : vector<16x32xf32>
    %cst_165 = arith.constant dense<0.000000e+00> : vector<16xf32>
    %405 = vector.multi_reduction <add>, %404, %cst_165 [1] : vector<16x32xf32> to vector<16xf32>
    %406 = vector.shape_cast %405 : vector<16xf32> to vector<16x1xf32>
    %cst_166 = arith.constant 3.200000e+01 : f32
    %407 = vector.broadcast %cst_166 : f32 to vector<16x1xf32>
    %408 = arith.divf %406, %407 : vector<16x1xf32>
    %409 = vector.broadcast %408 : vector<16x1xf32> to vector<16x32xf32>
    %410 = arith.subf %404, %409 : vector<16x32xf32>
    %411 = arith.mulf %410, %410 : vector<16x32xf32>
    %cst_167 = arith.constant dense<0.000000e+00> : vector<16xf32>
    %412 = vector.multi_reduction <add>, %411, %cst_167 [1] : vector<16x32xf32> to vector<16xf32>
    %413 = vector.shape_cast %412 : vector<16xf32> to vector<16x1xf32>
    %cst_168 = arith.constant 3.200000e+01 : f32
    %414 = vector.broadcast %cst_168 : f32 to vector<16x1xf32>
    %415 = arith.divf %413, %414 : vector<16x1xf32>
    %416 = vector.broadcast %408 : vector<16x1xf32> to vector<16x32xf32>
    %417 = arith.subf %404, %416 : vector<16x32xf32>
    %cst_169 = arith.constant 9.99999996E-13 : f32
    %418 = vector.broadcast %cst_169 : f32 to vector<16x1xf32>
    %419 = arith.addf %415, %418 : vector<16x1xf32>
    %420 = math.rsqrt %419 : vector<16x1xf32>
    %421 = vector.broadcast %420 : vector<16x1xf32> to vector<16x32xf32>
    %422 = arith.mulf %417, %421 : vector<16x32xf32>
    %423 = vector.broadcast %257 : vector<1x32xf32> to vector<16x32xf32>
    %424 = arith.mulf %422, %423 : vector<16x32xf32>
    %425 = vector.broadcast %258 : vector<1x32xf32> to vector<16x32xf32>
    %426 = arith.addf %424, %425 : vector<16x32xf32>
    %427 = arith.truncf %426 : vector<16x32xf32> to vector<16x32xbf16>
    %c1_170 = arith.constant 1 : index
    %c0_171 = arith.constant 0 : index
    %c0_172 = arith.constant 0 : index
    %428 = vector.load %arg6[%c1_170, %c0_171, %c0_172] : memref<2x32x64xbf16, #tpu.memory_space<vmem>>, vector<1x32x64xbf16>
    %429 = vector.shape_cast %428 : vector<1x32x64xbf16> to vector<32x64xbf16>
    %cst_173 = arith.constant dense<0.000000e+00> : vector<16x64xf32>
    %430 = tpu.matmul %427, %429, %cst_173 {dimension_numbers = #tpu.dot_dimension_numbers<[1], [0], [0], [1], [0, 0, 1, 1], [], []>} : vector<16x32xbf16>, vector<32x64xbf16>, vector<16x64xf32> -> vector<16x64xf32>
    %431 = vector.broadcast %255 : vector<1x64xf32> to vector<16x64xf32>
    %432 = arith.addf %430, %431 : vector<16x64xf32>
    %433 = arith.mulf %432, %432 : vector<16x64xf32>
    %434 = arith.mulf %432, %433 : vector<16x64xf32>
    %cst_174 = arith.constant 4.471500e-02 : f32
    %435 = vector.broadcast %cst_174 : f32 to vector<16x64xf32>
    %436 = arith.mulf %435, %434 : vector<16x64xf32>
    %437 = arith.addf %432, %436 : vector<16x64xf32>
    %cst_175 = arith.constant 0.797884583 : f32
    %438 = vector.broadcast %cst_175 : f32 to vector<16x64xf32>
    %439 = arith.mulf %438, %437 : vector<16x64xf32>
    %440 = math.tanh %439 : vector<16x64xf32>
    %cst_176 = arith.constant 1.000000e+00 : f32
    %441 = vector.broadcast %cst_176 : f32 to vector<16x64xf32>
    %442 = arith.addf %441, %440 : vector<16x64xf32>
    %cst_177 = arith.constant 5.000000e-01 : f32
    %443 = vector.broadcast %cst_177 : f32 to vector<16x64xf32>
    %444 = arith.mulf %443, %442 : vector<16x64xf32>
    %445 = arith.mulf %432, %444 : vector<16x64xf32>
    %446 = arith.truncf %445 : vector<16x64xf32> to vector<16x64xbf16>
    %c1_178 = arith.constant 1 : index
    %c0_179 = arith.constant 0 : index
    %c0_180 = arith.constant 0 : index
    %447 = vector.load %arg7[%c1_178, %c0_179, %c0_180] : memref<2x64x32xbf16, #tpu.memory_space<vmem>>, vector<1x64x32xbf16>
    %448 = vector.shape_cast %447 : vector<1x64x32xbf16> to vector<64x32xbf16>
    %cst_181 = arith.constant dense<0.000000e+00> : vector<16x32xf32>
    %449 = tpu.matmul %446, %448, %cst_181 {dimension_numbers = #tpu.dot_dimension_numbers<[1], [0], [0], [1], [0, 0, 1, 1], [], []>} : vector<16x64xbf16>, vector<64x32xbf16>, vector<16x32xf32> -> vector<16x32xf32>
    %450 = vector.broadcast %256 : vector<1x32xf32> to vector<16x32xf32>
    %451 = arith.addf %449, %450 : vector<16x32xf32>
    %452 = arith.addf %426, %451 : vector<16x32xf32>
    %cst_182 = arith.constant dense<0.000000e+00> : vector<16xf32>
    %453 = vector.multi_reduction <add>, %452, %cst_182 [1] : vector<16x32xf32> to vector<16xf32>
    %454 = vector.shape_cast %453 : vector<16xf32> to vector<16x1xf32>
    %cst_183 = arith.constant 3.200000e+01 : f32
    %455 = vector.broadcast %cst_183 : f32 to vector<16x1xf32>
    %456 = arith.divf %454, %455 : vector<16x1xf32>
    %457 = vector.broadcast %456 : vector<16x1xf32> to vector<16x32xf32>
    %458 = arith.subf %452, %457 : vector<16x32xf32>
    %459 = arith.mulf %458, %458 : vector<16x32xf32>
    %cst_184 = arith.constant dense<0.000000e+00> : vector<16xf32>
    %460 = vector.multi_reduction <add>, %459, %cst_184 [1] : vector<16x32xf32> to vector<16xf32>
    %461 = vector.shape_cast %460 : vector<16xf32> to vector<16x1xf32>
    %cst_185 = arith.constant 3.200000e+01 : f32
    %462 = vector.broadcast %cst_185 : f32 to vector<16x1xf32>
    %463 = arith.divf %461, %462 : vector<16x1xf32>
    %464 = vector.broadcast %456 : vector<16x1xf32> to vector<16x32xf32>
    %465 = arith.subf %452, %464 : vector<16x32xf32>
    %cst_186 = arith.constant 9.99999996E-13 : f32
    %466 = vector.broadcast %cst_186 : f32 to vector<16x1xf32>
    %467 = arith.addf %463, %466 : vector<16x1xf32>
    %468 = math.rsqrt %467 : vector<16x1xf32>
    %469 = vector.broadcast %468 : vector<16x1xf32> to vector<16x32xf32>
    %470 = arith.mulf %465, %469 : vector<16x32xf32>
    %471 = vector.broadcast %259 : vector<1x32xf32> to vector<16x32xf32>
    %472 = arith.mulf %470, %471 : vector<16x32xf32>
    %473 = vector.broadcast %260 : vector<1x32xf32> to vector<16x32xf32>
    %474 = arith.addf %472, %473 : vector<16x32xf32>
    %c0_187 = arith.constant 0 : index
    %c0_188 = arith.constant 0 : index
    %475 = vector.load %arg8[%c0_187, %c0_188] : memref<16x32xf32, #tpu.memory_space<vmem>>, vector<16x32xf32>
    tpu.vector_store %arg8[%c0_187, %c0_188], %474 {strides = array<i32>} : memref<16x32xf32, #tpu.memory_space<vmem>>, vector<16x32xf32>,
    return
  }
  func.func @transform_0(%arg0: i32) -> (i32, i32) {
    %c0_i32 = arith.constant 0 : i32
    %c0_i32_0 = arith.constant 0 : i32
    %c0_i32_1 = arith.constant 0 : i32
    return %c0_i32, %c0_i32_0 : i32, i32
  }
  func.func @transform_1(%arg0: i32) -> (i32, i32) {
    %c0_i32 = arith.constant 0 : i32
    %c0_i32_0 = arith.constant 0 : i32
    %c0_i32_1 = arith.constant 0 : i32
    return %c0_i32, %c0_i32_0 : i32, i32
  }
  func.func @transform_2(%arg0: i32) -> (i32, i32) {
    %c0_i32 = arith.constant 0 : i32
    %c0_i32_0 = arith.constant 0 : i32
    %c0_i32_1 = arith.constant 0 : i32
    return %c0_i32, %c0_i32_0 : i32, i32
  }
  func.func @transform_3(%arg0: i32) -> (i32, i32, i32) {
    %c0_i32 = arith.constant 0 : i32
    %c0_i32_0 = arith.constant 0 : i32
    %c0_i32_1 = arith.constant 0 : i32
    %c0_i32_2 = arith.constant 0 : i32
    return %c0_i32, %c0_i32_0, %c0_i32_1 : i32, i32, i32
  }
  func.func @transform_4(%arg0: i32) -> (i32, i32, i32) {
    %c0_i32 = arith.constant 0 : i32
    %c0_i32_0 = arith.constant 0 : i32
    %c0_i32_1 = arith.constant 0 : i32
    %c0_i32_2 = arith.constant 0 : i32
    return %c0_i32, %c0_i32_0, %c0_i32_1 : i32, i32, i32
  }
  func.func @transform_5(%arg0: i32) -> (i32, i32, i32) {
    %c0_i32 = arith.constant 0 : i32
    %c0_i32_0 = arith.constant 0 : i32
    %c0_i32_1 = arith.constant 0 : i32
    %c0_i32_2 = arith.constant 0 : i32
    return %c0_i32, %c0_i32_0, %c0_i32_1 : i32, i32, i32
  }
  func.func @transform_6(%arg0: i32) -> (i32, i32, i32) {
    %c0_i32 = arith.constant 0 : i32
    %c0_i32_0 = arith.constant 0 : i32
    %c0_i32_1 = arith.constant 0 : i32
    %c0_i32_2 = arith.constant 0 : i32
    return %c0_i32, %c0_i32_0, %c0_i32_1 : i32, i32, i32
  }
  func.func @transform_7(%arg0: i32) -> (i32, i32) {
    %c0_i32 = arith.constant 0 : i32
    %c0_i32_0 = arith.constant 0 : i32
    %c0_i32_1 = arith.constant 0 : i32
    return %c0_i32, %c0_i32_0 : i32, i32
  }
}

</mosaic_0001>

<bundles_post_ra>
// kernel: _lambda_.1
= control target key start
LH: loop header
LB: loop body
LE: loop exit
PB: predicated region body
PF: predicated region fallthrough
CT: control target
= control target key end

     0   :  { %vm36_vm0 = vcmask 261120   ;;  %s4723_s0 = inlined_call_operand.vmem [shape: f32[16,32], index: 0, kind: input, shape index: {}]   ;;  %s4724_s1 = inlined_call_operand.vmem [shape: s32[2,8], index: 1, kind: input, shape index: {}]   ;;  %s4725_s2 = inlined_call_operand.vmem [shape: f32[24,128], index: 2, kind: input, shape index: {}]   ;;  %s4726_s3 = inlined_call_operand.vmem [shape: bf16[2,32,96], index: 3, kind: input, shape index: {}]   ;;  %s4727_s4 = inlined_call_operand.vmem [shape: bf16[2,32,32], index: 4, kind: input, shape index: {}]   ;;  %s4728_s5 = inlined_call_operand.vmem [shape: bf16[2,32,64], index: 5, kind: input, shape index: {}]   ;;  %s4729_s6 = inlined_call_operand.vmem [shape: bf16[2,64,32], index: 6, kind: input, shape index: {}]   ;;  %s4730_s7 = inlined_call_operand.hbm [shape: f32[16,32], index: 7, kind: output, shape index: {}]  }
   0x1   :  { %v28_v0 = vld [vmem:[%s4723_s0] sm:$0xff]  ;;  %v29_v1 = vld [vmem:[%s4723_s0 + $0x8] sm:$0xff] }
   0x2   :  { %v37_v2 = vsel %vm36_vm0, %v28_v0, 0.0  ;;  %v40_v3 = vsel %vm36_vm0, %v29_v1, 0.0 }
   0x3   :  { %38 = vadd.xlane.f32.xlu0 %v37_v2 }
   0x7   :  { %41 = vadd.xlane.f32.xlu0 %v40_v3 }
   0x8   :  { %12 = vsyncpa [#allocation4], 0  ;;  %v4003_v14 = vld [vmem:[%s4726_s3] sm:$0xff]   ;;  %v4139_v15 = vmov 0.0   ;;  %v4004_v16 = vld [vmem:[%s4726_s3 + $0x8] sm:$0xff]   ;;  %vm4140_vm1 = vmmov 0   ;;  %v228_v45 = vlaneseq }
   0x9   :  { %3753 = vmatprep.subr.bf16.mxu0 %v4139_v15  ;;  %3766 = vmatprep.subr.mxu1 %v4139_v15  ;;  %v3547_v25 = vld [vmem:[%s4725_s2] ss:$0 sm:$0xff]  ;;  %v3548_v29 = vld [vmem:[%s4725_s2 + $0x1] ss:$0 sm:$0xff]  ;;  %v3549_v34 = vld [vmem:[%s4725_s2 + $0x2] ss:$0 sm:$0xff] }
   0xa   :  { %3754 = vmatpush3.bf16.msra.mxu0 %v4003_v14  ;;  %3757 = vmatprep.mubr.msk.bf16.mxu0 %vm4140_vm1, %v4139_v15  ;;  %s4141_s14 = smov 64   ;;  %s4142_s15 = smov 96   ;;  %vm152_vm2 = vcmask 64512   ;;  %v30_v43 = vld [vmem:[%s4724_s1] sm:$0x3]  ;;  %v4264_v47 = vshrl.u32 %v228_v45, 7 }
   0xb   :  { %3755 = vmatprep.subr.bf16.mxu0 %v4139_v15  ;;  %3768 = vmatprep.mubr.msk.f32.mxu1 %vm4140_vm1, %v4139_v15  ;;  %s4143_s16 = smov 88   ;;  %s4144_s17 = smov 120   ;;  %v31_v44 = vcvt.s32.f32 %v30_v43  ;;  %vm484_vm3 = vcmask 130112   ;;  %vm653_vm4 = vcmask 195712   ;;  %vm822_vm5 = vcmask 261312  }
   0xc   :  { %s4145_s18 = smov 80   ;;  %s4146_s19 = smov 112   ;;  %v230_v49 = vsub.s32 0, %v4264_v47  ;;  %vm1722_vm6 = vcmask 523264  }
   0xd   :  { %s4147_s20 = smov 104   ;;  %s4148_s21 = smov 72   ;;  %v32_v46 = vsub.f32 1.0, %v31_v44 }
   0xe   :  { %3756 = vmatpush3.bf16.msra.mxu0 %v4004_v16  ;;  %s4149_s22 = smov 48   ;;  %s4150_s1 = smov 56  }
   0xf   :  { %3761 = vmatprep.subr.mxu0 %v4139_v15  ;;  %v4266_v48 = vmul.f32 -10000.0, %v32_v46  ;;  %s4151_s25 = smov 40   ;;  %s4152_s26 = smov 8  }
  0x10   :  { %s4153_s27 = smov 16   ;;  %s4154_s0 = smov 24  }
  0x11   :  { %v4270_v50 = vrot.slane %v4266_v48, %v230_v49 }
  0x90   :  { %v39_v4 = vpop.xlane.xlu0 %38 }
  0x91   :  { %v44_v5 = vmul.f32 0.03125, %v39_v4 }
  0x93   :  { %v46_v6 = vsub.f32 %v28_v0, %v44_v5 }
  0x94   :  { %v42_v7 = vpop.xlane.xlu0 %41 }
  0x95   :  { %v45_v8 = vmul.f32 0.03125, %v42_v7  ;;  %v48_v9 = vmul.f32 %v46_v6, %v46_v6 }
  0x97   :  { %v47_v10 = vsub.f32 %v29_v1, %v45_v8  ;;  %v50_v11 = vsel %vm36_vm0, %v48_v9, 0.0 }
  0x98   :  { %51 = vadd.xlane.f32.xlu1 %v50_v11 }
  0x99   :  { %v49_v12 = vmul.f32 %v47_v10, %v47_v10 }
  0x9b   :  { %v53_v13 = vsel %vm36_vm0, %v49_v12, 0.0 }
  0x9c   :  { %54 = vadd.xlane.f32.xlu1 %v53_v13 }
 0x125   :  { %v52_v17 = vpop.xlane.xlu1 %51 }
 0x126   :  { %v56_v18 = vmul.f32 0.03125, %v52_v17 }
 0x128   :  { %v58_v19 = vadd.f32 1e-12, %v56_v18 }
 0x129   :  { %v55_v20 = vpop.xlane.xlu1 %54 }
 0x12a   :  { %4023 = vrsqrt.f32 %v58_v19  ;;  %v57_v21 = vmul.f32 0.03125, %v55_v20 }
 0x12c   :  { %v59_v22 = vadd.f32 1e-12, %v57_v21 }
 0x12e   :  { %4025 = vrsqrt.f32 %v59_v22 }
 0x134   :  { %v4024_v23 = vpop.eup %4023 }
 0x135   :  { %v62_v24 = vmul.f32 %v4024_v23, %v46_v6  ;;  %v904_v23 = vsub.s32 1, %v4264_v47 }
 0x137   :  { %v68_v28 = vmul.f32 %v3547_v25, %v62_v24 }
 0x138   :  { %v4026_v26 = vpop.eup %4025 }
 0x139   :  { %v63_v27 = vmul.f32 %v4026_v26, %v47_v10  ;;  %v4227_v31 = vadd.f32 %v3548_v29, %v68_v28 }
 0x13b   :  { %v69_v30 = vmul.f32 %v3547_v25, %v63_v27 }
 0x13d   :  { %v4229_v32 = vadd.f32 %v3548_v29, %v69_v30  ;;  %v4333_v29 = vrot.slane %v4266_v48, %v904_v23 }
 0x13f   :  { %v84_v33 = vpack.c.bf16 %v4229_v32, %v4227_v31 }
 0x141   :  { %3758 = vmatmul.mubr.msk.bf16.vlgmr.msra.gmra.mrb[0].mxu0 %vm36_vm0, %v84_v33 }
 0x142   :  { %3763 = vmatprep.mubr.msk.f32.mxu0 %vm4140_vm1, %v4139_v15 }
 0x214   :  { %v142_v35 = vpop.f32.mrb[0].mxu0 }
 0x215   :  { %v143_v36 = vadd.f32 %v3549_v34, %v142_v35  ;;  %v3759_v37 = vpop.f32.mrb[1].mxu0 }
 0x216   :  { %v145_v38 = vpop.f32.mrb[2].mxu0 }
 0x217   :  { %240 = vrot.lane.b32.xlu1 %v143_v36, %s4141_s14  ;;  %150 = vrot.lane.b32.xlu0 %v143_v36, %s4142_s15  ;;  %v3760_v39 = vpop.f32.mrb[3].mxu0  ;;  %v4246_v40 = vadd.f32 %v3549_v34, %v145_v38 }
 0x21b   :  { %319 = vrot.lane.b32.xlu1 %v143_v36, %s4143_s16  ;;  %317 = vrot.lane.b32.xlu0 %v143_v36, %s4144_s17 }
 0x21f   :  { %488 = vrot.lane.b32.xlu1 %v143_v36, %s4145_s18  ;;  %486 = vrot.lane.b32.xlu0 %v143_v36, %s4146_s19 }
 0x223   :  { %655 = vrot.lane.b32.xlu0 %v143_v36, %s4147_s20 }
 0x227   :  { %993 = vrot.lane.b32.xlu0 %v4246_v40, %s4143_s16 }
 0x22b   :  { %1161 = vrot.lane.b32.xlu0 %v4246_v40, %s4145_s18 }
 0x22f   :  { %1329 = vrot.lane.b32.xlu0 %v4246_v40, %s4148_s21 }
 0x233   :  { %573 = vrot.lane.b32.xlu0 %v143_v36, %s4149_s22 }
 0x289   :  { %v241_v41 = vpop.permute.xlu1 %240  ;;  %v151_v42 = vpop.permute.xlu0 %150 }
 0x28a   :  { %3762 = vmatpush3.xpose.msk.msra.mxu0 %vm152_vm2, %v151_v42  ;;  %3767 = vmatpush3.msra.mxu1 %v241_v41 }
 0x28b   :  { %3771 = vmatprep.subr.mxu1 %v4139_v15  ;;  %3776 = vmatprep.subr.mxu0 %v4139_v15 }
 0x28d   :  { %3764 = vmatmul.mubr.msk.f32.vlgmr.msra.gmra.mrb[4].mxu0 %vm152_vm2, %v143_v36  ;;  %v320_v58 = vpop.permute.xlu1 %319  ;;  %v318_v62 = vpop.permute.xlu0 %317 }
 0x28e   :  { %3778 = vmatprep.mubr.msk.f32.mxu0 %vm4140_vm1, %v4139_v15 }
 0x291   :  { %v489_v59 = vpop.permute.xlu1 %488  ;;  %v487_v3 = vpop.permute.xlu0 %486 }
 0x295   :  { %v656_v5 = vpop.permute.xlu0 %655 }
 0x299   :  { %v994_v8 = vpop.permute.xlu0 %993 }
 0x29d   :  { %v1162_v9 = vpop.permute.xlu0 %1161 }
 0x2a1   :  { %v1330_v10 = vpop.permute.xlu0 %1329 }
 0x360   :  { %v223_v51 = vpop.f32.mrb[4].mxu0 }
 0x361   :  { %v227_v52 = vmul.f32 0.35355338, %v223_v51  ;;  %v3765_v53 = vpop.f32.mrb[5].mxu0 }
 0x363   :  { %v232_v54 = vadd.f32 %v4270_v50, %v227_v52 }
 0x365   :  { %v233_v55 = vmul.f32 1.442695, %v232_v54 }
 0x367   :  { %4027 = vpow2.f32 %v233_v55 }
 0x371   :  { %v4028_v56 = vpop.eup %4027 }
 0x372   :  { %v235_v57 = vsel %vm152_vm2, %v4028_v56, 0.0 }
 0x373   :  { %236 = vadd.xlane.f32.xlu1 %v235_v57 }
 0x384   :  { %657 = vrot.lane.b32.xlu1 %v143_v36, %s4148_s21 }
 0x388   :  { %825 = vrot.lane.b32.xlu1 %v4246_v40, %s4142_s15 }
 0x38c   :  { %991 = vrot.lane.b32.xlu1 %v4246_v40, %s4144_s17 }
 0x390   :  { %1159 = vrot.lane.b32.xlu1 %v4246_v40, %s4146_s19 }
 0x394   :  { %1327 = vrot.lane.b32.xlu1 %v4246_v40, %s4147_s20 }
 0x398   :  { %404 = vrot.lane.b32.xlu1 %v143_v36, %s4150_s1 }
 0x39c   :  { %742 = vrot.lane.b32.xlu1 %v143_v36, %s4151_s25 }
 0x3a0   :  { %914 = vrot.lane.b32.xlu1 %v4246_v40, %s4141_s14 }
 0x400   :  { %v237_v60 = vpop.xlane.xlu1 %236 }
 0x401   :  { %4029 = vrcp.f32 %v237_v60 }
 0x404   :  { %v658_v61 = vpop.permute.xlu1 %657 }
 0x408   :  { %v826_v63 = vpop.permute.xlu1 %825 }
 0x40b   :  { %v4030_v0 = vpop.eup %4029 }
 0x40c   :  { %v992_v1 = vpop.permute.xlu1 %991  ;;  %v239_v2 = vmul.f32 %v4030_v0, %v4028_v56 }
 0x40e   :  { %3769 = vmatmul.mubr.msk.f32.vlgmr.msra.gmra.mrb[0].mxu1 %vm152_vm2, %v239_v2 }
 0x40f   :  { %3772 = vmatpush3.xpose.msk.msra.mxu1 %vm152_vm2, %v320_v58  ;;  %3773 = vmatprep.mubr.msk.f32.mxu1 %vm4140_vm1, %v4139_v15 }
 0x410   :  { %v1160_v4 = vpop.permute.xlu1 %1159  ;;  %3781 = vmatprep.subr.mxu1 %v4139_v15 }
 0x412   :  { %3774 = vmatmul.mubr.msk.f32.vlgmr.msra.gmra.mrb[2].mxu1 %vm152_vm2, %v318_v62 }
 0x413   :  { %3782 = vmatpush3.xpose.msk.msra.mxu1 %vm152_vm2, %v489_v59  ;;  %3783 = vmatprep.mubr.msk.f32.mxu1 %vm4140_vm1, %v4139_v15 }
 0x414   :  { %v1328_v6 = vpop.permute.xlu1 %1327  ;;  %3791 = vmatprep.subr.mxu1 %v4139_v15 }
 0x416   :  { %3784 = vmatmul.mubr.msk.f32.vlgmr.msra.gmra.mrb[4].mxu1 %vm152_vm2, %v487_v3 }
 0x417   :  { %3792 = vmatpush3.xpose.msk.msra.mxu1 %vm152_vm2, %v658_v61  ;;  %3793 = vmatprep.mubr.msk.f32.mxu1 %vm4140_vm1, %v4139_v15 }
 0x418   :  { %v405_v7 = vpop.permute.xlu1 %404  ;;  %3801 = vmatprep.subr.mxu1 %v4139_v15 }
 0x419   :  { %3777 = vmatpush3.msra.mxu0 %v405_v7 }
 0x41a   :  { %3794 = vmatmul.mubr.msk.f32.vlgmr.msra.gmra.mrb[6].mxu1 %vm152_vm2, %v656_v5  ;;  %3786 = vmatprep.subr.mxu0 %v4139_v15 }
 0x41b   :  { %3802 = vmatpush3.xpose.msk.msra.mxu1 %vm152_vm2, %v826_v63  ;;  %3803 = vmatprep.mubr.msk.f32.mxu1 %vm4140_vm1, %v4139_v15 }
 0x41c   :  { %3811 = vmatprep.subr.mxu1 %v4139_v15  ;;  %v743_v5 = vpop.permute.xlu1 %742 }
 0x41e   :  { %3804 = vmatmul.mubr.msk.f32.vlgmr.msra.gmra.mrb[8].mxu1 %vm152_vm2, %v4246_v40 }
 0x41f   :  { %3812 = vmatpush3.xpose.msk.msra.mxu1 %vm152_vm2, %v994_v8  ;;  %3813 = vmatprep.mubr.msk.f32.mxu1 %vm4140_vm1, %v4139_v15 }
 0x420   :  { %3821 = vmatprep.subr.mxu1 %v4139_v15  ;;  %v915_v7 = vpop.permute.xlu1 %914 }
 0x422   :  { %3814 = vmatmul.mubr.msk.f32.vlgmr.msra.gmra.mrb[10].mxu1 %vm152_vm2, %v992_v1 }
 0x423   :  { %3822 = vmatpush3.xpose.msk.msra.mxu1 %vm152_vm2, %v1162_v9  ;;  %3823 = vmatprep.mubr.msk.f32.mxu1 %vm4140_vm1, %v4139_v15 }
 0x424   :  { %3831 = vmatprep.subr.mxu1 %v4139_v15 }
 0x426   :  { %3824 = vmatmul.mubr.msk.f32.vlgmr.msra.gmra.mrb[12].mxu1 %vm152_vm2, %v1160_v4 }
 0x427   :  { %3832 = vmatpush3.xpose.msk.msra.mxu1 %vm152_vm2, %v1330_v10  ;;  %3833 = vmatprep.mubr.msk.f32.mxu1 %vm4140_vm1, %v4139_v15 }
 0x428   :  { %3841 = vmatprep.subr.bf16.mxu1 %v4139_v15 }
 0x42a   :  { %3834 = vmatmul.mubr.msk.f32.vlgmr.msra.gmra.mrb[14].mxu1 %vm152_vm2, %v1328_v6  ;;  %v574_v6 = vpop.permute.xlu0 %573 }
 0x42b   :  { %3845 = vmatprep.mubr.msk.bf16.mxu1 %vm4140_vm1, %v4139_v15 }
 0x4e1   :  { %v312_v11 = vpop.f32.mrb[0].mxu1 }
 0x4e2   :  { %316 = vst.msk [vmem:[#allocation2] sm:$0xff] %vm152_vm2, %v312_v11  ;;  %v3770_v12 = vpop.f32.mrb[1].mxu1 }
 0x4e5   :  { %v391_v13 = vpop.f32.mrb[2].mxu1 }
 0x4e6   :  { %v395_v14 = vmul.f32 0.35355338, %v391_v13  ;;  %v3775_v16 = vpop.f32.mrb[3].mxu1 }
 0x4e8   :  { %v396_v17 = vadd.f32 %v395_v14, %v4270_v50 }
 0x4e9   :  { %v560_v18 = vpop.f32.mrb[4].mxu1 }
 0x4ea   :  { %v397_v19 = vmul.f32 1.442695, %v396_v17  ;;  %v564_v20 = vmul.f32 0.35355338, %v560_v18  ;;  %v3785_v21 = vpop.f32.mrb[5].mxu1 }
 0x4ec   :  { %4031 = vpow2.f32 %v397_v19  ;;  %v565_v22 = vadd.f32 %v564_v20, %v4270_v50 }
 0x4ed   :  { %v729_v24 = vpop.f32.mrb[6].mxu1 }
 0x4ee   :  { %v566_v25 = vmul.f32 1.442695, %v565_v22  ;;  %v733_v26 = vmul.f32 0.35355338, %v729_v24  ;;  %v3795_v27 = vpop.f32.mrb[7].mxu1 }
 0x4f0   :  { %4033 = vpow2.f32 %v566_v25  ;;  %v734_v28 = vadd.f32 %v733_v26, %v4270_v50 }
 0x4f1   :  { %v897_v30 = vpop.f32.mrb[8].mxu1 }
 0x4f2   :  { %v735_v33 = vmul.f32 1.442695, %v734_v28  ;;  %v901_v34 = vmul.f32 0.35355338, %v897_v30  ;;  %v3805_v35 = vpop.f32.mrb[9].mxu1 }
 0x4f4   :  { %4035 = vpow2.f32 %v735_v33  ;;  %v906_v36 = vadd.f32 %v4333_v29, %v901_v34 }
 0x4f5   :  { %v1065_v37 = vpop.f32.mrb[10].mxu1 }
 0x4f6   :  { %v4032_v38 = vpop.eup %4031  ;;  %v907_v39 = vmul.f32 1.442695, %v906_v36  ;;  %v1069_v41 = vmul.f32 0.35355338, %v1065_v37  ;;  %v3815_v42 = vpop.f32.mrb[11].mxu1 }
 0x4f7   :  { %v399_v43 = vsel %vm152_vm2, %v4032_v38, 0.0 }
 0x4f8   :  { %4037 = vpow2.f32 %v907_v39  ;;  %v1070_v44 = vadd.f32 %v1069_v41, %v4333_v29  ;;  %400 = vadd.xlane.f32.xlu0 %v399_v43 }
 0x4f9   :  { %v1233_v45 = vpop.f32.mrb[12].mxu1 }
 0x4fa   :  { %v4034_v46 = vpop.eup %4033  ;;  %v1071_v47 = vmul.f32 1.442695, %v1070_v44  ;;  %v3825_v48 = vpop.f32.mrb[13].mxu1  ;;  %v1237_v0 = vmul.f32 0.35355338, %v1233_v45 }
 0x4fb   :  { %v568_v49 = vsel %vm152_vm2, %v4034_v46, 0.0 }
 0x4fc   :  { %4039 = vpow2.f32 %v1071_v47  ;;  %569 = vadd.xlane.f32.xlu1 %v568_v49  ;;  %v1238_v1 = vadd.f32 %v1237_v0, %v4333_v29  ;;  %v4006_v47 = vld [vmem:[%s4727_s4 + $0x8] sm:$0xff]  }
 0x4fd   :  { %v1401_v51 = vpop.f32.mrb[14].mxu1 }
 0x4fe   :  { %v4036_v52 = vpop.eup %4035  ;;  %v1405_v53 = vmul.f32 0.35355338, %v1401_v51  ;;  %v3835_v54 = vpop.f32.mrb[15].mxu1  ;;  %v1239_v2 = vmul.f32 1.442695, %v1238_v1 }
 0x4ff   :  { %v737_v55 = vsel %vm152_vm2, %v4036_v52, 0.0 }
 0x500   :  { %v1406_v56 = vadd.f32 %v1405_v53, %v4333_v29  ;;  %738 = vadd.xlane.f32.xlu0 %v737_v55 }
 0x502   :  { %v4038_v57 = vpop.eup %4037  ;;  %v1407_v58 = vmul.f32 1.442695, %v1406_v56 }
 0x503   :  { %v909_v59 = vsel %vm152_vm2, %v4038_v57, 0.0 }
 0x504   :  { %4041 = vpow2.f32 %v1407_v58  ;;  %910 = vadd.xlane.f32.xlu0 %v909_v59 }
 0x505   :  { %4043 = vpow2.f32 %v1239_v2 }
 0x506   :  { %v4040_v60 = vpop.eup %4039 }
 0x507   :  { %v1073_v61 = vsel %vm152_vm2, %v4040_v60, 0.0 }
 0x508   :  { %1074 = vadd.xlane.f32.xlu0 %v1073_v61 }
 0x50d   :  { %1078 = vrot.lane.b32.xlu1 %v4246_v40, %s4150_s1 }
 0x50e   :  { %v4345_v62 = vpop.eup %4041 }
 0x50f   :  { %v1409_v63 = vsel %vm152_vm2, %v4345_v62, 0.0  ;;  %v4044_v3 = vpop.eup %4043 }
 0x510   :  { %1410 = vadd.xlane.f32.xlu0 %v1409_v63  ;;  %v1241_v4 = vsel %vm152_vm2, %v4044_v3, 0.0 }
 0x526   :  { %1246 = vrot.lane.b32.xlu0 %v4246_v40, %s4149_s22 }
 0x531   :  { %1242 = vadd.xlane.f32.xlu1 %v1241_v4 }
 0x542   :  { %1414 = vrot.lane.b32.xlu1 %v4246_v40, %s4151_s25 }
 0x585   :  { %v401_v8 = vpop.xlane.xlu0 %400 }
 0x586   :  { %4045 = vrcp.f32 %v401_v8 }
 0x589   :  { %v570_v9 = vpop.xlane.xlu1 %569 }
 0x58a   :  { %4047 = vrcp.f32 %v570_v9 }
 0x58d   :  { %v739_v10 = vpop.xlane.xlu0 %738  ;;  %v1079_v22 = vpop.permute.xlu1 %1078 }
 0x58e   :  { %4049 = vrcp.f32 %v739_v10 }
 0x590   :  { %v4046_v11 = vpop.eup %4045 }
 0x591   :  { %v403_v12 = vmul.f32 %v4046_v11, %v4032_v38  ;;  %v911_v13 = vpop.xlane.xlu0 %910 }
 0x592   :  { %4051 = vrcp.f32 %v911_v13 }
 0x593   :  { %3779 = vmatmul.mubr.msk.f32.vlgmr.msra.gmra.mrb[6].mxu0 %vm152_vm2, %v403_v12 }
 0x594   :  { %v4048_v14 = vpop.eup %4047  ;;  %3787 = vmatpush3.msra.mxu0 %v574_v6  ;;  %3788 = vmatprep.mubr.msk.f32.mxu0 %vm4140_vm1, %v4139_v15 }
 0x595   :  { %v572_v40 = vmul.f32 %v4048_v14, %v4034_v46  ;;  %v1075_v16 = vpop.xlane.xlu0 %1074  ;;  %3796 = vmatprep.subr.mxu0 %v4139_v15  ;;  %v4005_v46 = vld [vmem:[%s4727_s4] sm:$0xff]  }
 0x596   :  { %4053 = vrcp.f32 %v1075_v16  ;;  %3842 = vmatpush3.bf16.msra.mxu1 %v4005_v46 }
 0x597   :  { %3789 = vmatmul.mubr.msk.f32.vlgmr.msra.gmra.mrb[8].mxu0 %vm152_vm2, %v572_v40  ;;  %3843 = vmatprep.subr.bf16.mxu1 %v4139_v15 }
 0x598   :  { %v4050_v17 = vpop.eup %4049  ;;  %3797 = vmatpush3.msra.mxu0 %v743_v5  ;;  %3798 = vmatprep.mubr.msk.f32.mxu0 %vm4140_vm1, %v4139_v15 }
 0x599   :  { %v741_v18 = vmul.f32 %v4050_v17, %v4036_v52  ;;  %3806 = vmatprep.subr.mxu0 %v4139_v15 }
 0x59a   :  { %3844 = vmatpush3.bf16.msra.mxu1 %v4006_v47 }
 0x59b   :  { %3799 = vmatmul.mubr.msk.f32.vlgmr.msra.gmra.mrb[10].mxu0 %vm152_vm2, %v741_v18  ;;  %3857 = vmatprep.subr.bf16.mxu1 %v4139_v15  ;;  %v4008_v18 = vld [vmem:[%s4728_s5 + $0x8] sm:$0xff]  }
 0x59c   :  { %v4052_v19 = vpop.eup %4051  ;;  %3807 = vmatpush3.msra.mxu0 %v915_v7  ;;  %3808 = vmatprep.mubr.msk.f32.mxu0 %vm4140_vm1, %v4139_v15 }
 0x59d   :  { %v913_v20 = vmul.f32 %v4052_v19, %v4038_v57  ;;  %v1411_v21 = vpop.xlane.xlu0 %1410  ;;  %3816 = vmatprep.subr.mxu0 %v4139_v15 }
 0x59f   :  { %3809 = vmatmul.mubr.msk.f32.vlgmr.msra.gmra.mrb[12].mxu0 %vm152_vm2, %v913_v20 }
 0x5a0   :  { %v4054_v23 = vpop.eup %4053  ;;  %3817 = vmatpush3.msra.mxu0 %v1079_v22  ;;  %3818 = vmatprep.mubr.msk.f32.mxu0 %vm4140_vm1, %v4139_v15 }
 0x5a1   :  { %v1077_v24 = vmul.f32 %v4054_v23, %v4040_v60  ;;  %v1247_v25 = vpop.permute.xlu0 %1246  ;;  %3826 = vmatprep.subr.mxu0 %v4139_v15 }
 0x5a3   :  { %3819 = vmatmul.mubr.msk.f32.vlgmr.msra.gmra.mrb[14].mxu0 %vm152_vm2, %v1077_v24 }
 0x5a4   :  { %3827 = vmatpush3.msra.mxu0 %v1247_v25  ;;  %3828 = vmatprep.mubr.msk.f32.mxu0 %vm4140_vm1, %v4139_v15 }
 0x5a5   :  { %3836 = vmatprep.subr.mxu0 %v4139_v15 }
 0x5be   :  { %v1243_v26 = vpop.xlane.xlu1 %1242 }
 0x5bf   :  { %4055 = vrcp.f32 %v1243_v26 }
 0x5c0   :  { %4057 = vrcp.f32 %v1411_v21 }
 0x5c2   :  { %v1415_v33 = vpop.permute.xlu1 %1414 }
 0x5c9   :  { %v4056_v27 = vpop.eup %4055 }
 0x5ca   :  { %v1245_v28 = vmul.f32 %v4056_v27, %v4044_v3  ;;  %v4058_v30 = vpop.eup %4057  ;;  %v3581_v27 = vld [vmem:[%s4725_s2 + $0x6] ss:$0 sm:$0xff] }
 0x5cb   :  { %v1413_v34 = vmul.f32 %v4058_v30, %v4345_v62  ;;  %v3577_v62 = vld [vmem:[%s4725_s2 + $0x3] ss:$0 sm:$0xff] }
 0x5cc   :  { %3829 = vmatmul.mubr.msk.f32.vlgmr.msra.gmra.mrb[16].mxu0 %vm152_vm2, %v1245_v28 }
 0x5cd   :  { %3837 = vmatpush3.msra.mxu0 %v1415_v33  ;;  %3838 = vmatprep.mubr.msk.f32.mxu0 %vm4140_vm1, %v4139_v15 }
 0x5ce   :  { %3849 = vmatprep.subr.bf16.mxu0 %v4139_v15 }
 0x5d0   :  { %3839 = vmatmul.mubr.msk.f32.vlgmr.msra.gmra.mrb[18].mxu0 %vm152_vm2, %v1413_v34  ;;  %v3582_v34 = vld [vmem:[%s4725_s2 + $0x7] ss:$0 sm:$0xff] }
 0x5d1   :  { %3853 = vmatprep.mubr.msk.bf16.mxu0 %vm4140_vm1, %v4139_v15 }
 0x666   :  { %v476_v35 = vpop.f32.mrb[6].mxu0 }
 0x667   :  { %481 = vrot.lane.b32.xlu0 %v476_v35, %s4152_s26  ;;  %v3780_v36 = vpop.f32.mrb[7].mxu0 }
 0x66a   :  { %v645_v37 = vpop.f32.mrb[8].mxu0 }
 0x66b   :  { %650 = vrot.lane.b32.xlu0 %v645_v37, %s4153_s27  ;;  %v3790_v38 = vpop.f32.mrb[9].mxu0 }
 0x66e   :  { %v814_v39 = vpop.f32.mrb[10].mxu0 }
 0x66f   :  { %819 = vrot.lane.b32.xlu0 %v814_v39, %s4154_s0  ;;  %v3800_v41 = vpop.f32.mrb[11].mxu0  ;;  %v4009_v39 = vld [vmem:[%s4729_s6] sm:$0xff]  }
 0x670   :  { %v4010_v41 = vld [vmem:[%s4729_s6 + $0x8] sm:$0xff]  }
 0x672   :  { %v986_v42 = vpop.f32.mrb[12].mxu0 }
 0x673   :  { %990 = vst.msk [vmem:[#allocation2 + $0x8] sm:$0xff] %vm152_vm2, %v986_v42  ;;  %v3810_v43 = vpop.f32.mrb[13].mxu0  ;;  %v4011_v42 = vld [vmem:[%s4729_s6 + $0x10] sm:$0xff]  }
 0x674   :  { %v4012_v43 = vld [vmem:[%s4729_s6 + $0x18] sm:$0xff]  }
 0x676   :  { %v1150_v44 = vpop.f32.mrb[14].mxu0 }
 0x677   :  { %1155 = vrot.lane.b32.xlu1 %v1150_v44, %s4152_s26  ;;  %v3820_v45 = vpop.f32.mrb[15].mxu0  ;;  %v3583_v44 = vld [vmem:[%s4725_s2 + $0x4] ss:$0 sm:$0xff] }
 0x69f   :  { %v1318_v48 = vpop.f32.mrb[16].mxu0 }
 0x6a0   :  { %1323 = vrot.lane.b32.xlu1 %v1318_v48, %s4153_s27  ;;  %v3830_v49 = vpop.f32.mrb[17].mxu0 }
 0x6a3   :  { %v1486_v51 = vpop.f32.mrb[18].mxu0 }
 0x6a4   :  { %1491 = vrot.lane.b32.xlu1 %v1486_v51, %s4154_s0  ;;  %v3840_v52 = vpop.f32.mrb[19].mxu0 }
 0x6d9   :  { %v482_v53 = vpop.permute.xlu0 %481 }
 0x6da   :  { %485 = vst.msk [vmem:[#allocation2] sm:$0xff] %vm484_vm3, %v482_v53 }
 0x6dd   :  { %v651_v54 = vpop.permute.xlu0 %650 }
 0x6de   :  { %654 = vst.msk [vmem:[#allocation2] sm:$0xff] %vm653_vm4, %v651_v54 }
 0x6e1   :  { %v820_v55 = vpop.permute.xlu0 %819 }
 0x6e2   :  { %823 = vst.msk [vmem:[#allocation2] sm:$0xff] %vm822_vm5, %v820_v55 }
 0x6e9   :  { %v1156_v56 = vpop.permute.xlu1 %1155  ;;  %v1495_v59 = vld [vmem:[#allocation2] sm:$0xff] }
 0x6ea   :  { %1158 = vst.msk [vmem:[#allocation2 + $0x8] sm:$0xff] %vm484_vm3, %v1156_v56 }
 0x712   :  { %v1324_v57 = vpop.permute.xlu1 %1323 }
 0x713   :  { %1326 = vst.msk [vmem:[#allocation2 + $0x8] sm:$0xff] %vm653_vm4, %v1324_v57 }
 0x716   :  { %v1492_v58 = vpop.permute.xlu1 %1491 }
 0x717   :  { %1494 = vst.msk [vmem:[#allocation2 + $0x8] sm:$0xff] %vm822_vm5, %v1492_v58 }
 0x71e   :  { %v1496_v60 = vld [vmem:[#allocation2 + $0x8] sm:$0xff] }
 0x71f   :  { %v1497_v61 = vpack.c.bf16 %v1496_v60, %v1495_v59 }
 0x721   :  { %3846 = vmatmul.mubr.msk.bf16.vlgmr.msra.gmra.mrb[16].mxu1 %vm36_vm0, %v1497_v61 }
 0x722   :  { %3865 = vmatprep.mubr.msk.bf16.mxu1 %vm4140_vm1, %v4139_v15  ;;  %3858 = vmatpush3.bf16.msra.mxu1 %v4009_v39 }
 0x723   :  { %3859 = vmatprep.subr.bf16.mxu1 %v4139_v15 }
 0x726   :  { %3860 = vmatpush3.bf16.msra.mxu1 %v4010_v41 }
 0x727   :  { %3861 = vmatprep.subr.bf16.mxu1 %v4139_v15 }
 0x72a   :  { %3862 = vmatpush3.bf16.msra.mxu1 %v4011_v42 }
 0x72b   :  { %3863 = vmatprep.subr.bf16.mxu1 %v4139_v15 }
 0x72e   :  { %3864 = vmatpush3.bf16.msra.mxu1 %v4012_v43 }
 0x72f   :  { %3887 = vmatprep.subr.mxu1 %v4139_v15 }
 0x7f4   :  { %v1555_v63 = vpop.f32.mrb[16].mxu1 }
 0x7f5   :  { %v1556_v0 = vadd.f32 %v3577_v62, %v1555_v63  ;;  %v3847_v1 = vpop.f32.mrb[17].mxu1 }
 0x7f6   :  { %v1558_v2 = vpop.f32.mrb[18].mxu1 }
 0x7f7   :  { %v1559_v3 = vadd.f32 %v3577_v62, %v1558_v2  ;;  %v3848_v4 = vpop.f32.mrb[19].mxu1  ;;  %v1562_v5 = vadd.f32 %v1556_v0, %v4227_v31 }
 0x7f9   :  { %v1564_v6 = vsel %vm36_vm0, %v1562_v5, 0.0  ;;  %v1563_v7 = vadd.f32 %v1559_v3, %v4229_v32  ;;  %v4007_v32 = vld [vmem:[%s4728_s5] sm:$0xff]  }
 0x7fa   :  { %1565 = vadd.xlane.f32.xlu0 %v1564_v6  ;;  %3850 = vmatpush3.bf16.msra.mxu0 %v4007_v32 }
 0x7fb   :  { %v1567_v8 = vsel %vm36_vm0, %v1563_v7, 0.0  ;;  %3851 = vmatprep.subr.bf16.mxu0 %v4139_v15 }
 0x7fc   :  { %1568 = vadd.xlane.f32.xlu1 %v1567_v8 }
 0x7fe   :  { %3852 = vmatpush3.bf16.msra.mxu0 %v4008_v18 }
 0x7ff   :  { %3869 = vmatprep.subr.bf16.mxu0 %v4139_v15 }
 0x887   :  { %v1566_v9 = vpop.xlane.xlu0 %1565 }
 0x888   :  { %v1570_v10 = vmul.f32 0.03125, %v1566_v9 }
 0x889   :  { %v1569_v11 = vpop.xlane.xlu1 %1568 }
 0x88a   :  { %v1572_v12 = vsub.f32 %v1562_v5, %v1570_v10  ;;  %v1571_v13 = vmul.f32 0.03125, %v1569_v11 }
 0x88c   :  { %v1573_v14 = vsub.f32 %v1563_v7, %v1571_v13  ;;  %v1574_v40 = vmul.f32 %v1572_v12, %v1572_v12  ;;  %v3587_v7 = vld [vmem:[%s4725_s2 + $0x5] ss:$0 sm:$0xff] }
 0x88e   :  { %v1576_v16 = vsel %vm36_vm0, %v1574_v40, 0.0  ;;  %v1575_v17 = vmul.f32 %v1573_v14, %v1573_v14 }
 0x88f   :  { %1577 = vadd.xlane.f32.xlu0 %v1576_v16 }
 0x890   :  { %v1579_v31 = vsel %vm36_vm0, %v1575_v17, 0.0 }
 0x893   :  { %1580 = vadd.xlane.f32.xlu0 %v1579_v31 }
 0x91c   :  { %v1578_v19 = vpop.xlane.xlu0 %1577 }
 0x91d   :  { %v1582_v20 = vmul.f32 0.03125, %v1578_v19 }
 0x91f   :  { %v1584_v21 = vadd.f32 1e-12, %v1582_v20 }
 0x920   :  { %v1581_v22 = vpop.xlane.xlu0 %1580 }
 0x921   :  { %4059 = vrsqrt.f32 %v1584_v21  ;;  %v1583_v23 = vmul.f32 0.03125, %v1581_v22 }
 0x923   :  { %v1585_v24 = vadd.f32 1e-12, %v1583_v23 }
 0x925   :  { %4061 = vrsqrt.f32 %v1585_v24 }
 0x92b   :  { %v4060_v25 = vpop.eup %4059 }
 0x92c   :  { %v1588_v26 = vmul.f32 %v4060_v25, %v1572_v12 }
 0x92e   :  { %v1594_v30 = vmul.f32 %v3581_v27, %v1588_v26  ;;  %v4013_v26 = vld [vmem:[%s4726_s3 + $0x10] sm:$0xff]  }
 0x92f   :  { %v4062_v28 = vpop.eup %4061 }
 0x930   :  { %v1589_v33 = vmul.f32 %v4062_v28, %v1573_v14  ;;  %v1600_v36 = vadd.f32 %v3582_v34, %v1594_v30 }
 0x932   :  { %v1595_v35 = vmul.f32 %v3581_v27, %v1589_v33  ;;  %v4014_v27 = vld [vmem:[%s4726_s3 + $0x18] sm:$0xff]  }
 0x934   :  { %v1601_v37 = vadd.f32 %v3582_v34, %v1595_v35 }
 0x936   :  { %v1602_v38 = vpack.c.bf16 %v1601_v37, %v1600_v36 }
 0x938   :  { %3854 = vmatmul.mubr.msk.bf16.vlgmr.msra.gmra.mrb[20].mxu0 %vm36_vm0, %v1602_v38  ;;  %v3593_v38 = vld [vmem:[%s4725_s2 + $0x8] ss:$0 sm:$0xff] }
 0x939   :  { %3873 = vmatprep.mubr.msk.bf16.mxu0 %vm4140_vm1, %v4139_v15  ;;  %3870 = vmatpush3.bf16.msra.mxu0 %v4013_v26 }
 0x93a   :  { %3871 = vmatprep.subr.bf16.mxu0 %v4139_v15 }
 0x93d   :  { %3872 = vmatpush3.bf16.msra.mxu0 %v4014_v27 }
 0x93e   :  { %3877 = vmatprep.subr.mxu0 %v4139_v15 }
 0xa0b   :  { %v1660_v45 = vpop.f32.mrb[20].mxu0 }
 0xa0c   :  { %v1661_v46 = vadd.f32 %v3583_v44, %v1660_v45  ;;  %v3855_v47 = vpop.f32.mrb[21].mxu0 }
 0xa0d   :  { %v1663_v48 = vpop.f32.mrb[22].mxu0 }
 0xa0e   :  { %v1667_v49 = vmul.f32 %v1661_v46, %v1661_v46  ;;  %v1664_v51 = vadd.f32 %v3583_v44, %v1663_v48  ;;  %v3856_v52 = vpop.f32.mrb[23].mxu0  ;;  %v3594_v44 = vld [vmem:[%s4725_s2 + $0x9] ss:$0 sm:$0xff] }
 0xa10   :  { %v1669_v53 = vmul.f32 %v1667_v49, %v1661_v46  ;;  %v1668_v54 = vmul.f32 %v1664_v51, %v1664_v51  ;;  %v3599_v49 = vld [vmem:[%s4725_s2 + $0xa] ss:$0 sm:$0xff] }
 0xa12   :  { %v1671_v55 = vmul.f32 0.044715, %v1669_v53  ;;  %v1670_v56 = vmul.f32 %v1668_v54, %v1664_v51 }
 0xa14   :  { %v1673_v57 = vadd.f32 %v1671_v55, %v1661_v46  ;;  %v1672_v58 = vmul.f32 0.044715, %v1670_v56 }
 0xa16   :  { %v1675_v59 = vmul.f32 0.7978846, %v1673_v57  ;;  %v1674_v60 = vadd.f32 %v1672_v58, %v1664_v51 }
 0xa18   :  { %4063 = vtanh.f32 %v1675_v59  ;;  %v1676_v61 = vmul.f32 0.7978846, %v1674_v60 }
 0xa1a   :  { %4065 = vtanh.f32 %v1676_v61 }
 0xa22   :  { %v4064_v62 = vpop.eup %4063 }
 0xa23   :  { %v1679_v63 = vadd.f32 1.0, %v4064_v62 }
 0xa24   :  { %v4066_v0 = vpop.eup %4065 }
 0xa25   :  { %v1681_v1 = vmul.f32 0.5, %v1679_v63  ;;  %v1680_v2 = vadd.f32 1.0, %v4066_v0 }
 0xa27   :  { %v1682_v3 = vmul.f32 0.5, %v1680_v2  ;;  %v1683_v4 = vmul.f32 %v1681_v1, %v1661_v46 }
 0xa29   :  { %v1684_v5 = vmul.f32 %v1682_v3, %v1664_v51 }
 0xa2b   :  { %v1685_v6 = vpack.c.bf16 %v1684_v5, %v1683_v4 }
 0xa2d   :  { %3866 = vmatmul.mubr.msk.bf16.vlgmr.msra.gmra.mrb[20].mxu1 %vm1722_vm6, %v1685_v6 }
 0xa2e   :  { %3889 = vmatprep.mubr.msk.f32.mxu1 %vm4140_vm1, %v4139_v15 }
 0xb00   :  { %v1760_v8 = vpop.f32.mrb[20].mxu1 }
 0xb01   :  { %v1761_v9 = vadd.f32 %v3587_v7, %v1760_v8  ;;  %v3867_v10 = vpop.f32.mrb[21].mxu1 }
 0xb02   :  { %v1763_v11 = vpop.f32.mrb[22].mxu1 }
 0xb03   :  { %v1764_v12 = vadd.f32 %v3587_v7, %v1763_v11  ;;  %v3868_v13 = vpop.f32.mrb[23].mxu1  ;;  %v1767_v14 = vadd.f32 %v1761_v9, %v1600_v36 }
 0xb05   :  { %v1769_v40 = vsel %vm36_vm0, %v1767_v14, 0.0  ;;  %v1768_v16 = vadd.f32 %v1764_v12, %v1601_v37 }
 0xb06   :  { %1770 = vadd.xlane.f32.xlu0 %v1769_v40 }
 0xb07   :  { %v1772_v17 = vsel %vm36_vm0, %v1768_v16, 0.0 }
 0xb08   :  { %1773 = vadd.xlane.f32.xlu1 %v1772_v17 }
 0xb93   :  { %v1771_v31 = vpop.xlane.xlu0 %1770 }
 0xb94   :  { %v1775_v32 = vmul.f32 0.03125, %v1771_v31 }
 0xb95   :  { %v1774_v18 = vpop.xlane.xlu1 %1773 }
 0xb96   :  { %v1777_v19 = vsub.f32 %v1767_v14, %v1775_v32  ;;  %v1776_v20 = vmul.f32 0.03125, %v1774_v18 }
 0xb98   :  { %v1778_v21 = vsub.f32 %v1768_v16, %v1776_v20  ;;  %v1779_v22 = vmul.f32 %v1777_v19, %v1777_v19 }
 0xb9a   :  { %v1781_v23 = vsel %vm36_vm0, %v1779_v22, 0.0  ;;  %v1780_v24 = vmul.f32 %v1778_v21, %v1778_v21 }
 0xb9b   :  { %1782 = vadd.xlane.f32.xlu0 %v1781_v23 }
 0xb9c   :  { %v1784_v25 = vsel %vm36_vm0, %v1780_v24, 0.0 }
 0xb9d   :  { %1785 = vadd.xlane.f32.xlu1 %v1784_v25 }
 0xc28   :  { %v1783_v28 = vpop.xlane.xlu0 %1782 }
 0xc29   :  { %v1787_v30 = vmul.f32 0.03125, %v1783_v28 }
 0xc2a   :  { %v1786_v33 = vpop.xlane.xlu1 %1785 }
 0xc2b   :  { %v1789_v34 = vadd.f32 1e-12, %v1787_v30  ;;  %v1788_v35 = vmul.f32 0.03125, %v1786_v33 }
 0xc2d   :  { %4067 = vrsqrt.f32 %v1789_v34  ;;  %v1790_v36 = vadd.f32 1e-12, %v1788_v35 }
 0xc2f   :  { %4069 = vrsqrt.f32 %v1790_v36 }
 0xc37   :  { %v4068_v37 = vpop.eup %4067 }
 0xc38   :  { %v1793_v39 = vmul.f32 %v4068_v37, %v1777_v19 }
 0xc39   :  { %v4070_v41 = vpop.eup %4069 }
 0xc3a   :  { %v1799_v42 = vmul.f32 %v3593_v38, %v1793_v39  ;;  %v1794_v43 = vmul.f32 %v4070_v41, %v1778_v21 }
 0xc3c   :  { %v1800_v45 = vmul.f32 %v3593_v38, %v1794_v43  ;;  %v4476_v46 = vadd.f32 %v3594_v44, %v1799_v42 }
 0xc3e   :  { %v4478_v47 = vadd.f32 %v3594_v44, %v1800_v45 }
 0xc40   :  { %v1815_v48 = vpack.c.bf16 %v4478_v47, %v4476_v46 }
 0xc42   :  { %3874 = vmatmul.mubr.msk.bf16.vlgmr.msra.gmra.mrb[24].mxu0 %vm36_vm0, %v1815_v48 }
 0xc43   :  { %3879 = vmatprep.mubr.msk.f32.mxu0 %vm4140_vm1, %v4139_v15 }
 0xd15   :  { %v1874_v51 = vpop.f32.mrb[24].mxu0 }
 0xd16   :  { %v1875_v52 = vadd.f32 %v3599_v49, %v1874_v51  ;;  %v3875_v53 = vpop.f32.mrb[25].mxu0 }
 0xd17   :  { %v1877_v54 = vpop.f32.mrb[26].mxu0 }
 0xd18   :  { %2046 = vrot.lane.b32.xlu1 %v1875_v52, %s4143_s16  ;;  %1882 = vrot.lane.b32.xlu0 %v1875_v52, %s4142_s15  ;;  %v3876_v55 = vpop.f32.mrb[27].mxu0  ;;  %v4494_v56 = vadd.f32 %v3599_v49, %v1877_v54 }
 0xd1c   :  { %2044 = vrot.lane.b32.xlu1 %v1875_v52, %s4144_s17  ;;  %2212 = vrot.lane.b32.xlu0 %v1875_v52, %s4146_s19 }
 0xd20   :  { %2214 = vrot.lane.b32.xlu1 %v1875_v52, %s4145_s18  ;;  %2380 = vrot.lane.b32.xlu0 %v1875_v52, %s4147_s20 }
 0xd24   :  { %2382 = vrot.lane.b32.xlu1 %v1875_v52, %s4148_s21  ;;  %2713 = vrot.lane.b32.xlu0 %v4494_v56, %s4143_s16  ;;  %s4155_s16 = smov [#allocation3]  }
 0xd28   :  { %2881 = vrot.lane.b32.xlu0 %v4494_v56, %s4145_s18  ;;  %2549 = vrot.lane.b32.xlu1 %v4494_v56, %s4142_s15 }
 0xd2c   :  { %3049 = vrot.lane.b32.xlu0 %v4494_v56, %s4148_s21  ;;  %2711 = vrot.lane.b32.xlu1 %v4494_v56, %s4144_s17  ;;  %s3536_s17 = sshll.u32 %s4155_s16, 4  ;;  %s3537_s17 = int_to_ptr.vmem [resolvable:$true] %s3536_s17 }
 0xd2d   :  { %p4120_p1 = scmp.lt.s32.totalorder %s3537_s17, %s3537_s17 }
 0xd30   :  { %2131 = vrot.lane.b32.xlu0 %v1875_v52, %s4150_s1  ;;  %2879 = vrot.lane.b32.xlu1 %v4494_v56, %s4146_s19 }
 0xd34   :  { %3047 = vrot.lane.b32.xlu1 %v4494_v56, %s4147_s20 }
 0xd38   :  { %1967 = vrot.lane.b32.xlu1 %v1875_v52, %s4141_s14 }
 0xd3c   :  { %2299 = vrot.lane.b32.xlu1 %v1875_v52, %s4149_s22 }
 0xd40   :  { %2467 = vrot.lane.b32.xlu1 %v1875_v52, %s4151_s25 }
 0xd44   :  { %2634 = vrot.lane.b32.xlu1 %v4494_v56, %s4141_s14 }
 0xd8a   :  { %v2047_v57 = vpop.permute.xlu1 %2046  ;;  %v1883_v58 = vpop.permute.xlu0 %1882 }
 0xd8b   :  { %3878 = vmatpush3.xpose.msk.msra.mxu0 %vm152_vm2, %v1883_v58  ;;  %3888 = vmatpush3.xpose.msk.msra.mxu1 %vm152_vm2, %v2047_v57 }
 0xd8c   :  { %3897 = vmatprep.subr.mxu1 %v4139_v15  ;;  %3882 = vmatprep.subr.mxu0 %v4139_v15 }
 0xd8e   :  { %v2045_v59 = vpop.permute.xlu1 %2044  ;;  %3880 = vmatmul.mubr.msk.f32.vlgmr.msra.gmra.mrb[28].mxu0 %vm152_vm2, %v1875_v52  ;;  %v2213_v60 = vpop.permute.xlu0 %2212 }
 0xd8f   :  { %3890 = vmatmul.mubr.msk.f32.vlgmr.msra.gmra.mrb[24].mxu1 %vm152_vm2, %v2045_v59  ;;  %3884 = vmatprep.mubr.msk.f32.mxu0 %vm4140_vm1, %v4139_v15 }
 0xd90   :  { %3899 = vmatprep.mubr.msk.f32.mxu1 %vm4140_vm1, %v4139_v15 }
 0xd92   :  { %v2215_v61 = vpop.permute.xlu1 %2214  ;;  %v2381_v62 = vpop.permute.xlu0 %2380 }
 0xd93   :  { %3898 = vmatpush3.xpose.msk.msra.mxu1 %vm152_vm2, %v2215_v61 }
 0xd94   :  { %3907 = vmatprep.subr.mxu1 %v4139_v15 }
 0xd96   :  { %v2383_v63 = vpop.permute.xlu1 %2382  ;;  %3900 = vmatmul.mubr.msk.f32.vlgmr.msra.gmra.mrb[26].mxu1 %vm152_vm2, %v2213_v60  ;;  %v2714_v0 = vpop.permute.xlu0 %2713 }
 0xd97   :  { %3908 = vmatpush3.xpose.msk.msra.mxu1 %vm152_vm2, %v2383_v63  ;;  %3909 = vmatprep.mubr.msk.f32.mxu1 %vm4140_vm1, %v4139_v15 }
 0xd98   :  { %3917 = vmatprep.subr.mxu1 %v4139_v15 }
 0xd9a   :  { %3910 = vmatmul.mubr.msk.f32.vlgmr.msra.gmra.mrb[28].mxu1 %vm152_vm2, %v2381_v62  ;;  %v2550_v1 = vpop.permute.xlu1 %2549  ;;  %v2882_v3 = vpop.permute.xlu0 %2881 }
 0xd9b   :  { %3918 = vmatpush3.xpose.msk.msra.mxu1 %vm152_vm2, %v2550_v1  ;;  %3919 = vmatprep.mubr.msk.f32.mxu1 %vm4140_vm1, %v4139_v15 }
 0xd9c   :  { %3927 = vmatprep.subr.mxu1 %v4139_v15 }
 0xd9e   :  { %3920 = vmatmul.mubr.msk.f32.vlgmr.msra.gmra.mrb[30].mxu1 %vm152_vm2, %v4494_v56  ;;  %v2712_v2 = vpop.permute.xlu1 %2711  ;;  %v3050_v5 = vpop.permute.xlu0 %3049 }
 0xd9f   :  { %3928 = vmatpush3.xpose.msk.msra.mxu1 %vm152_vm2, %v2714_v0  ;;  %3929 = vmatprep.mubr.msk.f32.mxu1 %vm4140_vm1, %v4139_v15 }
 0xda0   :  { %3937 = vmatprep.subr.mxu1 %v4139_v15 }
 0xda2   :  { %3930 = vmatmul.mubr.msk.f32.vlgmr.msra.gmra.mrb[32].mxu1 %vm152_vm2, %v2712_v2  ;;  %v2880_v4 = vpop.permute.xlu1 %2879 }
 0xda3   :  { %3938 = vmatpush3.xpose.msk.msra.mxu1 %vm152_vm2, %v2882_v3  ;;  %3939 = vmatprep.mubr.msk.f32.mxu1 %vm4140_vm1, %v4139_v15 }
 0xda4   :  { %3947 = vmatprep.subr.mxu1 %v4139_v15 }
 0xda6   :  { %3940 = vmatmul.mubr.msk.f32.vlgmr.msra.gmra.mrb[34].mxu1 %vm152_vm2, %v2880_v4  ;;  %v3048_v6 = vpop.permute.xlu1 %3047 }
 0xda7   :  { %3948 = vmatpush3.xpose.msk.msra.mxu1 %vm152_vm2, %v3050_v5  ;;  %3949 = vmatprep.mubr.msk.f32.mxu1 %vm4140_vm1, %v4139_v15 }
 0xda8   :  { %3957 = vmatprep.subr.bf16.mxu1 %v4139_v15 }
 0xdaa   :  { %3950 = vmatmul.mubr.msk.f32.vlgmr.msra.gmra.mrb[36].mxu1 %vm152_vm2, %v3048_v6  ;;  %v1968_v7 = vpop.permute.xlu1 %1967 }
 0xdab   :  { %3883 = vmatpush3.msra.mxu0 %v1968_v7  ;;  %3961 = vmatprep.mubr.msk.bf16.mxu1 %vm4140_vm1, %v4139_v15  ;;  %v2132_v7 = vpop.permute.xlu0 %2131 }
 0xdac   :  { %3892 = vmatprep.subr.mxu0 %v4139_v15 }
 0xdae   :  { %v2300_v5 = vpop.permute.xlu1 %2299 }
 0xdb2   :  { %v2468_v6 = vpop.permute.xlu1 %2467 }
 0xe61   :  { %v1954_v8 = vpop.f32.mrb[28].mxu0 }
 0xe62   :  { %v1958_v9 = vmul.f32 0.35355338, %v1954_v8  ;;  %v3881_v10 = vpop.f32.mrb[29].mxu0  ;;  %v2118_v11 = vpop.f32.mrb[24].mxu1 }
 0xe63   :  { %v2122_v12 = vmul.f32 0.35355338, %v2118_v11  ;;  %v3891_v13 = vpop.f32.mrb[25].mxu1  ;;  %v2635_v8 = vpop.permute.xlu1 %2634 }
 0xe64   :  { %v1959_v14 = vadd.f32 %v1958_v9, %v4270_v50 }
 0xe65   :  { %v2123_v40 = vadd.f32 %v2122_v12, %v4270_v50 }
 0xe66   :  { %v1960_v16 = vmul.f32 1.442695, %v1959_v14 }
 0xe67   :  { %v2124_v17 = vmul.f32 1.442695, %v2123_v40 }
 0xe68   :  { %4071 = vpow2.f32 %v1960_v16 }
 0xe69   :  { %4073 = vpow2.f32 %v2124_v17  ;;  %v2286_v31 = vpop.f32.mrb[26].mxu1 }
 0xe6a   :  { %v2290_v32 = vmul.f32 0.35355338, %v2286_v31  ;;  %v3901_v18 = vpop.f32.mrb[27].mxu1 }
 0xe6c   :  { %v2291_v19 = vadd.f32 %v2290_v32, %v4270_v50 }
 0xe6d   :  { %v2454_v20 = vpop.f32.mrb[28].mxu1 }
 0xe6e   :  { %v2292_v21 = vmul.f32 1.442695, %v2291_v19  ;;  %v2458_v22 = vmul.f32 0.35355338, %v2454_v20  ;;  %v3911_v23 = vpop.f32.mrb[29].mxu1 }
 0xe70   :  { %4075 = vpow2.f32 %v2292_v21  ;;  %v2459_v24 = vadd.f32 %v2458_v22, %v4270_v50 }
 0xe71   :  { %v2621_v25 = vpop.f32.mrb[30].mxu1 }
 0xe72   :  { %v4563_v26 = vpop.eup %4071  ;;  %v2460_v27 = vmul.f32 1.442695, %v2459_v24  ;;  %v2625_v28 = vmul.f32 0.35355338, %v2621_v25  ;;  %v3921_v30 = vpop.f32.mrb[31].mxu1 }
 0xe73   :  { %v4565_v33 = vpop.eup %4073  ;;  %v1962_v34 = vsel %vm152_vm2, %v4563_v26, 0.0 }
 0xe74   :  { %4077 = vpow2.f32 %v2460_v27  ;;  %v2626_v35 = vadd.f32 %v2625_v28, %v4333_v29  ;;  %1963 = vadd.xlane.f32.xlu0 %v1962_v34  ;;  %v2126_v36 = vsel %vm152_vm2, %v4565_v33, 0.0 }
 0xe75   :  { %2127 = vadd.xlane.f32.xlu1 %v2126_v36  ;;  %v2785_v50 = vpop.f32.mrb[32].mxu1 }
 0xe76   :  { %v2627_v37 = vmul.f32 1.442695, %v2626_v35  ;;  %v3931_v38 = vpop.f32.mrb[33].mxu1  ;;  %v2789_v0 = vmul.f32 0.35355338, %v2785_v50 }
 0xe78   :  { %4079 = vpow2.f32 %v2627_v37  ;;  %v2790_v1 = vadd.f32 %v2789_v0, %v4333_v29 }
 0xe79   :  { %v2953_v39 = vpop.f32.mrb[34].mxu1 }
 0xe7a   :  { %v4076_v41 = vpop.eup %4075  ;;  %v2957_v42 = vmul.f32 0.35355338, %v2953_v39  ;;  %v3941_v43 = vpop.f32.mrb[35].mxu1  ;;  %v2791_v2 = vmul.f32 1.442695, %v2790_v1 }
 0xe7b   :  { %v2294_v44 = vsel %vm152_vm2, %v4076_v41, 0.0 }
 0xe7c   :  { %v2958_v45 = vadd.f32 %v2957_v42, %v4333_v29  ;;  %2295 = vadd.xlane.f32.xlu0 %v2294_v44 }
 0xe7d   :  { %v3121_v48 = vpop.f32.mrb[36].mxu1 }
 0xe7e   :  { %v4078_v49 = vpop.eup %4077  ;;  %v2959_v51 = vmul.f32 1.442695, %v2958_v45  ;;  %v3125_v52 = vmul.f32 0.35355338, %v3121_v48  ;;  %v3951_v53 = vpop.f32.mrb[37].mxu1  ;;  %v4015_v45 = vld [vmem:[%s4727_s4 + $0x10] sm:$0xff]  }
 0xe7f   :  { %v2462_v54 = vsel %vm152_vm2, %v4078_v49, 0.0  ;;  %3958 = vmatpush3.bf16.msra.mxu1 %v4015_v45  ;;  %v4016_v48 = vld [vmem:[%s4727_s4 + $0x18] sm:$0xff]   ;;  %s4115_s4 = scalar_lea.vmem %s3537_s17, 256 }
 0xe80   :  { %4081 = vpow2.f32 %v2959_v51  ;;  %v3126_v55 = vadd.f32 %v3125_v52, %v4333_v29  ;;  %2463 = vadd.xlane.f32.xlu0 %v2462_v54  ;;  %3959 = vmatprep.subr.bf16.mxu1 %v4139_v15  ;;  %p4116_p0 = scmp.ne.s32.totalorder %s3537_s17, %s4115_s4  ;;  %p4121_p2 = scmp.lt.s32.totalorder %s4115_s4, %s4115_s4 }
 0xe82   :  { %v4080_v57 = vpop.eup %4079  ;;  %v3127_v58 = vmul.f32 1.442695, %v3126_v55  ;;  %p4122_p3 = por %p4121_p2, %p4120_p1 }
 0xe83   :  { %v2629_v59 = vsel %vm152_vm2, %v4080_v57, 0.0  ;;  %3960 = vmatpush3.bf16.msra.mxu1 %v4016_v48 }
 0xe84   :  { %4083 = vpow2.f32 %v3127_v58  ;;  %2630 = vadd.xlane.f32.xlu0 %v2629_v59  ;;  %3973 = vmatprep.subr.bf16.mxu1 %v4139_v15  ;;  %p4123_p4 = pnand %p4122_p3, %p4116_p0 }
 0xe85   :  { %4085 = vpow2.f32 %v2791_v2  ;;  %v3631_v2 = vld [vmem:[%s4725_s2 + $0xb] ss:$0 sm:$0xff] }
 0xe86   :  { %2798 = vrot.lane.b32.xlu1 %v4494_v56, %s4150_s1 }
 0xe8a   :  { %v4579_v60 = vpop.eup %4081 }
 0xe8b   :  { %v2961_v61 = vsel %vm152_vm2, %v4579_v60, 0.0 }
 0xe8c   :  { %2962 = vadd.xlane.f32.xlu0 %v2961_v61 }
 0xe8e   :  { %v4583_v62 = vpop.eup %4083 }
 0xe8f   :  { %v3129_v63 = vsel %vm152_vm2, %v4583_v62, 0.0  ;;  %v4086_v3 = vpop.eup %4085 }
 0xe90   :  { %3130 = vadd.xlane.f32.xlu0 %v3129_v63  ;;  %v2793_v4 = vsel %vm152_vm2, %v4086_v3, 0.0 }
 0xea6   :  { %2966 = vrot.lane.b32.xlu0 %v4494_v56, %s4149_s22 }
 0xeaa   :  { %2794 = vadd.xlane.f32.xlu1 %v2793_v4 }
 0xebb   :  { %3134 = vrot.lane.b32.xlu1 %v4494_v56, %s4151_s25 }
 0xf01   :  { %v1964_v9 = vpop.xlane.xlu0 %1963 }
 0xf02   :  { %4087 = vrcp.f32 %v1964_v9  ;;  %v2128_v10 = vpop.xlane.xlu1 %2127 }
 0xf03   :  { %4089 = vrcp.f32 %v2128_v10 }
 0xf06   :  { %v2799_v20 = vpop.permute.xlu1 %2798 }
 0xf09   :  { %v2296_v29 = vpop.xlane.xlu0 %2295 }
 0xf0a   :  { %4091 = vrcp.f32 %v2296_v29 }
 0xf0c   :  { %v4088_v11 = vpop.eup %4087 }
 0xf0d   :  { %v1966_v12 = vmul.f32 %v4088_v11, %v4563_v26  ;;  %v2464_v13 = vpop.xlane.xlu0 %2463  ;;  %v4090_v14 = vpop.eup %4089 }
 0xf0e   :  { %4093 = vrcp.f32 %v2464_v13  ;;  %v2130_v56 = vmul.f32 %v4090_v14, %v4565_v33 }
 0xf0f   :  { %3885 = vmatmul.mubr.msk.f32.vlgmr.msra.gmra.mrb[30].mxu0 %vm152_vm2, %v1966_v12 }
 0xf10   :  { %3893 = vmatpush3.msra.mxu0 %v2132_v7  ;;  %3894 = vmatprep.mubr.msk.f32.mxu0 %vm4140_vm1, %v4139_v15 }
 0xf11   :  { %v2631_v40 = vpop.xlane.xlu0 %2630  ;;  %3902 = vmatprep.subr.mxu0 %v4139_v15 }
 0xf12   :  { %4095 = vrcp.f32 %v2631_v40 }
 0xf13   :  { %3895 = vmatmul.mubr.msk.f32.vlgmr.msra.gmra.mrb[32].mxu0 %vm152_vm2, %v2130_v56 }
 0xf14   :  { %v4092_v16 = vpop.eup %4091  ;;  %3903 = vmatpush3.msra.mxu0 %v2300_v5  ;;  %3904 = vmatprep.mubr.msk.f32.mxu0 %vm4140_vm1, %v4139_v15 }
 0xf15   :  { %v2298_v17 = vmul.f32 %v4092_v16, %v4076_v41  ;;  %3912 = vmatprep.subr.mxu0 %v4139_v15 }
 0xf17   :  { %3905 = vmatmul.mubr.msk.f32.vlgmr.msra.gmra.mrb[34].mxu0 %vm152_vm2, %v2298_v17 }
 0xf18   :  { %v4094_v31 = vpop.eup %4093  ;;  %3913 = vmatpush3.msra.mxu0 %v2468_v6  ;;  %3914 = vmatprep.mubr.msk.f32.mxu0 %vm4140_vm1, %v4139_v15 }
 0xf19   :  { %v2466_v32 = vmul.f32 %v4094_v31, %v4078_v49  ;;  %3922 = vmatprep.subr.mxu0 %v4139_v15  ;;  %v2963_v21 = vpop.xlane.xlu0 %2962 }
 0xf1b   :  { %3915 = vmatmul.mubr.msk.f32.vlgmr.msra.gmra.mrb[36].mxu0 %vm152_vm2, %v2466_v32 }
 0xf1c   :  { %v4096_v18 = vpop.eup %4095  ;;  %3923 = vmatpush3.msra.mxu0 %v2635_v8  ;;  %3924 = vmatprep.mubr.msk.f32.mxu0 %vm4140_vm1, %v4139_v15 }
 0xf1d   :  { %v2633_v19 = vmul.f32 %v4096_v18, %v4080_v57  ;;  %3932 = vmatprep.subr.mxu0 %v4139_v15  ;;  %v3131_v23 = vpop.xlane.xlu0 %3130  ;;  %v4018_v18 = vld [vmem:[%s4728_s5 + $0x18] sm:$0xff]  }
 0xf1f   :  { %3925 = vmatmul.mubr.msk.f32.vlgmr.msra.gmra.mrb[38].mxu0 %vm152_vm2, %v2633_v19 }
 0xf20   :  { %3933 = vmatpush3.msra.mxu0 %v2799_v20  ;;  %3934 = vmatprep.mubr.msk.f32.mxu0 %vm4140_vm1, %v4139_v15 }
 0xf21   :  { %3942 = vmatprep.subr.mxu0 %v4139_v15  ;;  %v2967_v27 = vpop.permute.xlu0 %2966 }
 0xf37   :  { %v2795_v22 = vpop.xlane.xlu1 %2794 }
 0xf38   :  { %4097 = vrcp.f32 %v2795_v22 }
 0xf39   :  { %4099 = vrcp.f32 %v2963_v21 }
 0xf3a   :  { %4101 = vrcp.f32 %v3131_v23 }
 0xf3b   :  { %v3135_v33 = vpop.permute.xlu1 %3134 }
 0xf42   :  { %v4098_v24 = vpop.eup %4097 }
 0xf43   :  { %v2797_v25 = vmul.f32 %v4098_v24, %v4086_v3  ;;  %v4100_v26 = vpop.eup %4099 }
 0xf44   :  { %v2965_v28 = vmul.f32 %v4100_v26, %v4579_v60  ;;  %v4102_v30 = vpop.eup %4101 }
 0xf45   :  { %3935 = vmatmul.mubr.msk.f32.vlgmr.msra.gmra.mrb[40].mxu0 %vm152_vm2, %v2797_v25  ;;  %v3133_v34 = vmul.f32 %v4102_v30, %v4583_v62 }
 0xf46   :  { %3943 = vmatpush3.msra.mxu0 %v2967_v27  ;;  %3944 = vmatprep.mubr.msk.f32.mxu0 %vm4140_vm1, %v4139_v15  ;;  %v3635_v27 = vld [vmem:[%s4725_s2 + $0xe] ss:$0 sm:$0xff] }
 0xf47   :  { %3952 = vmatprep.subr.mxu0 %v4139_v15 }
 0xf49   :  { %3945 = vmatmul.mubr.msk.f32.vlgmr.msra.gmra.mrb[42].mxu0 %vm152_vm2, %v2965_v28 }
 0xf4a   :  { %3953 = vmatpush3.msra.mxu0 %v3135_v33  ;;  %3954 = vmatprep.mubr.msk.f32.mxu0 %vm4140_vm1, %v4139_v15 }
 0xf4b   :  { %3965 = vmatprep.subr.bf16.mxu0 %v4139_v15 }
 0xf4d   :  { %3955 = vmatmul.mubr.msk.f32.vlgmr.msra.gmra.mrb[44].mxu0 %vm152_vm2, %v3133_v34  ;;  %v3636_v34 = vld [vmem:[%s4725_s2 + $0xf] ss:$0 sm:$0xff] }
 0xf4e   :  { %3969 = vmatprep.mubr.msk.bf16.mxu0 %vm4140_vm1, %v4139_v15 }
 0xfe2   :  { %v2039_v35 = vpop.f32.mrb[30].mxu0 }
 0xfe3   :  { %2043 = vst.msk [vmem:[#allocation2] sm:$0xff] %vm152_vm2, %v2039_v35  ;;  %v3886_v36 = vpop.f32.mrb[31].mxu0 }
 0xfe6   :  { %v2203_v50 = vpop.f32.mrb[32].mxu0 }
 0xfe7   :  { %2208 = vrot.lane.b32.xlu0 %v2203_v50, %s4152_s26  ;;  %v3896_v37 = vpop.f32.mrb[33].mxu0 }
 0xfea   :  { %v2371_v38 = vpop.f32.mrb[34].mxu0 }
 0xfeb   :  { %2376 = vrot.lane.b32.xlu0 %v2371_v38, %s4153_s27  ;;  %v3906_v39 = vpop.f32.mrb[35].mxu0  ;;  %v4019_v38 = vld [vmem:[%s4729_s6 + $0x20] sm:$0xff]  }
 0xfec   :  { %v4020_v39 = vld [vmem:[%s4729_s6 + $0x28] sm:$0xff]  }
 0xfee   :  { %v2539_v41 = vpop.f32.mrb[36].mxu0 }
 0xfef   :  { %2544 = vrot.lane.b32.xlu0 %v2539_v41, %s4154_s0  ;;  %v3916_v42 = vpop.f32.mrb[37].mxu0  ;;  %v4021_v41 = vld [vmem:[%s4729_s6 + $0x30] sm:$0xff]  }
 0xff0   :  { %v4022_v42 = vld [vmem:[%s4729_s6 + $0x38] sm:$0xff]  }
 0xff2   :  { %v2706_v43 = vpop.f32.mrb[38].mxu0 }
 0xff3   :  { %2710 = vst.msk [vmem:[#allocation2 + $0x8] sm:$0xff] %vm152_vm2, %v2706_v43  ;;  %v3926_v44 = vpop.f32.mrb[39].mxu0  ;;  %v3641_v43 = vld [vmem:[%s4725_s2 + $0xc] ss:$0 sm:$0xff] }
0x1018   :  { %v2870_v49 = vpop.f32.mrb[40].mxu0 }
0x1019   :  { %2875 = vrot.lane.b32.xlu1 %v2870_v49, %s4152_s26  ;;  %v3936_v51 = vpop.f32.mrb[41].mxu0 }
0x101c   :  { %v3038_v52 = vpop.f32.mrb[42].mxu0 }
0x101d   :  { %3043 = vrot.lane.b32.xlu1 %v3038_v52, %s4153_s27  ;;  %v3946_v53 = vpop.f32.mrb[43].mxu0 }
0x1020   :  { %v3206_v54 = vpop.f32.mrb[44].mxu0 }
0x1021   :  { %3211 = vrot.lane.b32.xlu1 %v3206_v54, %s4154_s0  ;;  %v3956_v55 = vpop.f32.mrb[45].mxu0 }
0x1059   :  { %v2209_v57 = vpop.permute.xlu0 %2208 }
0x105a   :  { %2211 = vst.msk [vmem:[#allocation2] sm:$0xff] %vm484_vm3, %v2209_v57 }
0x105d   :  { %v2377_v58 = vpop.permute.xlu0 %2376 }
0x105e   :  { %2379 = vst.msk [vmem:[#allocation2] sm:$0xff] %vm653_vm4, %v2377_v58 }
0x1061   :  { %v2545_v59 = vpop.permute.xlu0 %2544 }
0x1062   :  { %2547 = vst.msk [vmem:[#allocation2] sm:$0xff] %vm822_vm5, %v2545_v59 }
0x1069   :  { %v3215_v63 = vld [vmem:[#allocation2] sm:$0xff] }
0x108b   :  { %v2876_v60 = vpop.permute.xlu1 %2875 }
0x108c   :  { %2878 = vst.msk [vmem:[#allocation2 + $0x8] sm:$0xff] %vm484_vm3, %v2876_v60 }
0x108f   :  { %v3044_v61 = vpop.permute.xlu1 %3043 }
0x1090   :  { %3046 = vst.msk [vmem:[#allocation2 + $0x8] sm:$0xff] %vm653_vm4, %v3044_v61 }
0x1093   :  { %v3212_v62 = vpop.permute.xlu1 %3211 }
0x1094   :  { %3214 = vst.msk [vmem:[#allocation2 + $0x8] sm:$0xff] %vm822_vm5, %v3212_v62 }
0x109b   :  { %v3216_v0 = vld [vmem:[#allocation2 + $0x8] sm:$0xff] }
0x109c   :  { %v3217_v1 = vpack.c.bf16 %v3216_v0, %v3215_v63 }
0x109e   :  { %3962 = vmatmul.mubr.msk.bf16.vlgmr.msra.gmra.mrb[40].mxu1 %vm36_vm0, %v3217_v1 }
0x109f   :  { %3981 = vmatprep.mubr.msk.bf16.mxu1 %vm4140_vm1, %v4139_v15  ;;  %3974 = vmatpush3.bf16.msra.mxu1 %v4019_v38 }
0x10a0   :  { %3975 = vmatprep.subr.bf16.mxu1 %v4139_v15 }
0x10a3   :  { %3976 = vmatpush3.bf16.msra.mxu1 %v4020_v39 }
0x10a4   :  { %3977 = vmatprep.subr.bf16.mxu1 %v4139_v15 }
0x10a7   :  { %3978 = vmatpush3.bf16.msra.mxu1 %v4021_v41 }
0x10a8   :  { %3979 = vmatprep.subr.bf16.mxu1 %v4139_v15 }
0x10ab   :  { %3980 = vmatpush3.bf16.msra.mxu1 %v4022_v42 }
0x1171   :  { %v3276_v3 = vpop.f32.mrb[40].mxu1 }
0x1172   :  { %v3277_v4 = vadd.f32 %v3631_v2, %v3276_v3  ;;  %v3963_v5 = vpop.f32.mrb[41].mxu1 }
0x1173   :  { %v3279_v6 = vpop.f32.mrb[42].mxu1 }
0x1174   :  { %v3280_v7 = vadd.f32 %v3631_v2, %v3279_v6  ;;  %v3964_v8 = vpop.f32.mrb[43].mxu1  ;;  %v3283_v9 = vadd.f32 %v3277_v4, %v4476_v46 }
0x1175   :  { %v3653_v8 = vld [vmem:[%s4725_s2 + $0xd] ss:$0 sm:$0xff] }
0x1176   :  { %v3285_v10 = vsel %vm36_vm0, %v3283_v9, 0.0  ;;  %v3284_v29 = vadd.f32 %v3280_v7, %v4478_v47  ;;  %v4017_v47 = vld [vmem:[%s4728_s5 + $0x10] sm:$0xff]  }
0x1177   :  { %3286 = vadd.xlane.f32.xlu0 %v3285_v10  ;;  %3966 = vmatpush3.bf16.msra.mxu0 %v4017_v47 }
0x1178   :  { %v3288_v11 = vsel %vm36_vm0, %v3284_v29, 0.0  ;;  %3967 = vmatprep.subr.bf16.mxu0 %v4139_v15 }
0x1179   :  { %3289 = vadd.xlane.f32.xlu1 %v3288_v11 }
0x117b   :  { %3968 = vmatpush3.bf16.msra.mxu0 %v4018_v18 }
0x1204   :  { %v3287_v12 = vpop.xlane.xlu0 %3286 }
0x1205   :  { %v3291_v13 = vmul.f32 0.03125, %v3287_v12 }
0x1206   :  { %v3290_v14 = vpop.xlane.xlu1 %3289 }
0x1207   :  { %v3293_v56 = vsub.f32 %v3283_v9, %v3291_v13  ;;  %v3292_v40 = vmul.f32 0.03125, %v3290_v14 }
0x1209   :  { %v3294_v16 = vsub.f32 %v3284_v29, %v3292_v40  ;;  %v3295_v17 = vmul.f32 %v3293_v56, %v3293_v56 }
0x120b   :  { %v3297_v31 = vsel %vm36_vm0, %v3295_v17, 0.0  ;;  %v3296_v32 = vmul.f32 %v3294_v16, %v3294_v16 }
0x120c   :  { %3298 = vadd.xlane.f32.xlu0 %v3297_v31 }
0x120d   :  { %v3300_v46 = vsel %vm36_vm0, %v3296_v32, 0.0 }
0x1210   :  { %3301 = vadd.xlane.f32.xlu0 %v3300_v46 }
0x1299   :  { %v3299_v19 = vpop.xlane.xlu0 %3298 }
0x129a   :  { %v3303_v20 = vmul.f32 0.03125, %v3299_v19 }
0x129c   :  { %v3305_v21 = vadd.f32 1e-12, %v3303_v20 }
0x129d   :  { %v3302_v22 = vpop.xlane.xlu0 %3301 }
0x129e   :  { %4103 = vrsqrt.f32 %v3305_v21  ;;  %v3304_v23 = vmul.f32 0.03125, %v3302_v22 }
0x12a0   :  { %v3306_v24 = vadd.f32 1e-12, %v3304_v23 }
0x12a2   :  { %4105 = vrsqrt.f32 %v3306_v24 }
0x12a8   :  { %v4104_v25 = vpop.eup %4103 }
0x12a9   :  { %v3309_v26 = vmul.f32 %v4104_v25, %v3293_v56 }
0x12ab   :  { %v3315_v30 = vmul.f32 %v3635_v27, %v3309_v26 }
0x12ac   :  { %v4106_v28 = vpop.eup %4105 }
0x12ad   :  { %v3310_v33 = vmul.f32 %v4106_v28, %v3294_v16  ;;  %v3321_v36 = vadd.f32 %v3636_v34, %v3315_v30 }
0x12af   :  { %v3316_v35 = vmul.f32 %v3635_v27, %v3310_v33  ;;  %v3659_v33 = vld [vmem:[%s4725_s2 + $0x10] ss:$0 sm:$0xff] }
0x12b1   :  { %v3322_v50 = vadd.f32 %v3636_v34, %v3316_v35 }
0x12b3   :  { %v3323_v37 = vpack.c.bf16 %v3322_v50, %v3321_v36 }
0x12b5   :  { %3970 = vmatmul.mubr.msk.bf16.vlgmr.msra.gmra.mrb[48].mxu0 %vm36_vm0, %v3323_v37 }
0x1388   :  { %v3382_v44 = vpop.f32.mrb[48].mxu0 }
0x1389   :  { %v3383_v45 = vadd.f32 %v3641_v43, %v3382_v44  ;;  %v3971_v48 = vpop.f32.mrb[49].mxu0 }
0x138a   :  { %v3385_v49 = vpop.f32.mrb[50].mxu0 }
0x138b   :  { %v3389_v51 = vmul.f32 %v3383_v45, %v3383_v45  ;;  %v3386_v52 = vadd.f32 %v3641_v43, %v3385_v49  ;;  %v3972_v53 = vpop.f32.mrb[51].mxu0 }
0x138d   :  { %v3391_v54 = vmul.f32 %v3389_v51, %v3383_v45  ;;  %v3390_v55 = vmul.f32 %v3386_v52, %v3386_v52 }
0x138f   :  { %v3393_v57 = vmul.f32 0.044715, %v3391_v54  ;;  %v3392_v15 = vmul.f32 %v3390_v55, %v3386_v52 }
0x1391   :  { %v3395_v58 = vadd.f32 %v3393_v57, %v3383_v45  ;;  %v3394_v59 = vmul.f32 0.044715, %v3392_v15 }
0x1393   :  { %v3397_v60 = vmul.f32 0.7978846, %v3395_v58  ;;  %v3396_v61 = vadd.f32 %v3394_v59, %v3386_v52 }
0x1395   :  { %4107 = vtanh.f32 %v3397_v60  ;;  %v3398_v62 = vmul.f32 0.7978846, %v3396_v61 }
0x1397   :  { %4109 = vtanh.f32 %v3398_v62 }
0x139f   :  { %v4108_v63 = vpop.eup %4107 }
0x13a0   :  { %v3401_v0 = vadd.f32 1.0, %v4108_v63 }
0x13a1   :  { %v4110_v1 = vpop.eup %4109 }
0x13a2   :  { %v3403_v2 = vmul.f32 0.5, %v3401_v0  ;;  %v3402_v3 = vadd.f32 1.0, %v4110_v1 }
0x13a4   :  { %v3404_v4 = vmul.f32 0.5, %v3402_v3  ;;  %v3405_v5 = vmul.f32 %v3403_v2, %v3383_v45 }
0x13a6   :  { %v3406_v6 = vmul.f32 %v3404_v4, %v3386_v52 }
0x13a8   :  { %v3407_v7 = vpack.c.bf16 %v3406_v6, %v3405_v5 }
0x13aa   :  { %3982 = vmatmul.mubr.msk.bf16.vlgmr.msra.gmra.mrb[44].mxu1 %vm1722_vm6, %v3407_v7 }
0x147d   :  { %v3482_v9 = vpop.f32.mrb[44].mxu1 }
0x147e   :  { %v3483_v10 = vadd.f32 %v3653_v8, %v3482_v9  ;;  %v3983_v29 = vpop.f32.mrb[45].mxu1 }
0x147f   :  { %v3485_v11 = vpop.f32.mrb[46].mxu1 }
0x1480   :  { %v3486_v12 = vadd.f32 %v3653_v8, %v3485_v11  ;;  %v3984_v13 = vpop.f32.mrb[47].mxu1  ;;  %v3489_v14 = vadd.f32 %v3483_v10, %v3321_v36  ;;  %v3660_v36 = vld [vmem:[%s4725_s2 + $0x11] ss:$0 sm:$0xff] }
0x1482   :  { %v3491_v56 = vsel %vm36_vm0, %v3489_v14, 0.0  ;;  %v3490_v40 = vadd.f32 %v3486_v12, %v3322_v50 }
0x1483   :  { %3492 = vadd.xlane.f32.xlu0 %v3491_v56 }
0x1484   :  { %v3494_v16 = vsel %vm36_vm0, %v3490_v40, 0.0 }
0x1485   :  { %3495 = vadd.xlane.f32.xlu1 %v3494_v16 }
0x1510   :  { %v3493_v17 = vpop.xlane.xlu0 %3492 }
0x1511   :  { %v3497_v31 = vmul.f32 0.03125, %v3493_v17 }
0x1512   :  { %v3496_v32 = vpop.xlane.xlu1 %3495 }
0x1513   :  { %v3499_v46 = vsub.f32 %v3489_v14, %v3497_v31  ;;  %v3498_v47 = vmul.f32 0.03125, %v3496_v32 }
0x1515   :  { %v3500_v18 = vsub.f32 %v3490_v40, %v3498_v47  ;;  %v3501_v19 = vmul.f32 %v3499_v46, %v3499_v46 }
0x1517   :  { %v3503_v20 = vsel %vm36_vm0, %v3501_v19, 0.0  ;;  %v3502_v21 = vmul.f32 %v3500_v18, %v3500_v18 }
0x1518   :  { %3504 = vadd.xlane.f32.xlu0 %v3503_v20 }
0x1519   :  { %v3506_v22 = vsel %vm36_vm0, %v3502_v21, 0.0 }
0x151a   :  { %3507 = vadd.xlane.f32.xlu1 %v3506_v22 }
0x15a5   :  { %v3505_v23 = vpop.xlane.xlu0 %3504 }
0x15a6   :  { %v3509_v24 = vmul.f32 0.03125, %v3505_v23 }
0x15a7   :  { %v3508_v25 = vpop.xlane.xlu1 %3507 }
0x15a8   :  { %v3511_v26 = vadd.f32 1e-12, %v3509_v24  ;;  %v3510_v27 = vmul.f32 0.03125, %v3508_v25 }
0x15aa   :  { %4111 = vrsqrt.f32 %v3511_v26  ;;  %v3512_v28 = vadd.f32 1e-12, %v3510_v27 }
0x15ac   :  { %4113 = vrsqrt.f32 %v3512_v28 }
0x15b4   :  { %v4112_v30 = vpop.eup %4111 }
0x15b5   :  { %v3515_v34 = vmul.f32 %v4112_v30, %v3499_v46 }
0x15b6   :  { %v4114_v35 = vpop.eup %4113 }
0x15b7   :  { %v3516_v50 = vmul.f32 %v4114_v35, %v3500_v18  ;;  %v3521_v37 = vmul.f32 %v3659_v33, %v3515_v34 }
0x15b9   :  { %v3522_v38 = vmul.f32 %v3659_v33, %v3516_v50  ;;  %v3527_v39 = vadd.f32 %v3660_v36, %v3521_v37 }
0x15bb   :  { %v3528_v41 = vadd.f32 %v3660_v36, %v3522_v38  ;;  %3529 = vst.msk [vmem:[#allocation3] sm:$0xff] %vm36_vm0, %v3527_v39 }
0x15bd   :  { %3530 = vst.msk [vmem:[#allocation3 + $0x8] sm:$0xff] %vm36_vm0, %v3528_v41 }
0x15be   :  { %4126 = shalt.err (!%p4123_p4)
}
0x15bf   :  { %s4127_s19 = scalar_lea.hbm %s4730_s7, 256 }
0x15c0   :  { %p4128_p5 = scmp.ne.s32.totalorder %s4730_s7, %s4127_s19  ;;  %p4131_p6 = scmp.lt.u32.totalorder %s4127_s19, %s4730_s7 }
0x15c2   :  { %p4133_p7 = pnand %p4131_p6, %p4128_p5 }
0x15c4   :  { %4136 = shalt.err (!%p4133_p7)
}
0x15c5   :  { %s4156_s25 = smov 128  }
0x15c6   :  { %3542 = dma.vmem_to_hbm [thread:$0]  %s3537_s17, 256, %s4730_s7, [#allocation4], %s4156_s25, %s4156_s25, %s4152_s26  }
0x15c7   :  { %4137 = dma.done.wait [#allocation4], 256  }
0x15c8   :  { %4138 = vsyncadd [#allocation4], 4294967040 }
0x15c9   :  { %3546 = vsyncpa [#allocation4], 1 }

</bundles_post_ra>
